<compile_context>
chip_gen: v7x
topology: tpu7x:2x2x1
jax: 0.10.0
libtpu: 0.0.40
codegen_flags: <defaults>
</compile_context>

<pallas_src>
import jax
import jax.numpy as jnp
from jax.experimental import pallas as pl
from jax.experimental.pallas import tpu as pltpu


def _leaky_relu(x, slope=0.1):
    return jnp.where(x > 0, x, slope * x)


def _round_up(a, m):
    return (a + m - 1) // m * m


def discriminator_kernel(x_ref, w1t_ref, b1_ref, w2t_ref, b2_ref, w3_ref,
                         b3_ref, o_ref):
    # x tile: (tile, D) f32 -> feature-major (D, tile). The whole MLP is then
    # computed transposed so the 1-unit output layer is a lane-dense (1, tile)
    # row: full-lane store, 4 B/row of output HBM traffic, no padded lanes.
    xt = jnp.transpose(x_ref[...])                               # (D, tile) f32 (XLU)

    h1 = jnp.dot(w1t_ref[...], xt.astype(jnp.bfloat16),
                 preferred_element_type=jnp.float32) + b1_ref[...]   # (H, tile) f32
    h1 = _leaky_relu(h1)

    h2 = jnp.dot(w2t_ref[...], h1.astype(jnp.bfloat16),
                 preferred_element_type=jnp.float32) + b2_ref[...]   # (H, tile) f32
    h2 = _leaky_relu(h2)

    # Final Linear(H, 1): VPU multiply + sublane reduce -> naturally (1, tile).
    logits = jnp.sum(h2 * w3_ref[...], axis=0, keepdims=True) + b3_ref[...]
    o_ref[0] = jax.nn.sigmoid(logits).astype(o_ref.dtype)            # (1, tile)


def discriminator_forward(x, params, *, batch_tile=512):
    """x: (B, D) float32. Returns (B, 1) float32 in [0, 1]."""
    w1, b1, w2, b2, w3, b3 = params
    B, D = x.shape
    H = w1.shape[1]  # 256

    # Feature-major ("transposed") parameter layout; tiny one-time XLA work.
    w1t = jnp.asarray(w1.T, jnp.bfloat16)             # (H, D)
    w2t = jnp.asarray(w2.T, jnp.bfloat16)             # (H, H)
    b1c = jnp.asarray(b1.reshape(H, 1), jnp.float32)  # (H, 1)
    b2c = jnp.asarray(b2.reshape(H, 1), jnp.float32)  # (H, 1)
    w3c = jnp.asarray(w3.reshape(H, 1), jnp.float32)  # (H, 1)
    b3c = jnp.asarray(b3.reshape(1, 1), jnp.float32)  # (1, 1)

    # Batch tiling: rows must be a multiple of 8 (sublane); keep >= 2 grid
    # steps whenever the batch allows it so both v7x TensorCores get work.
    B_aligned = _round_up(B, 8)
    tile = min(batch_tile, max(8, _round_up(pl.cdiv(B_aligned, 2), 8)))
    n_tiles = pl.cdiv(B_aligned, tile)
    B_pad = n_tiles * tile
    if B_pad != B:
        # TODO(synk): a ragged-tail second call would avoid this XLA pad copy;
        # it only triggers when B is not already a multiple of the batch tile.
        x = jnp.pad(x, ((0, B_pad - B), (0, 0)))

    cost = pl.CostEstimate(
        flops=2 * B_pad * (D * H + H * H + H),
        transcendentals=B_pad,
        bytes_accessed=(B_pad * D * 4 + B_pad * 4
                        + (D * H + H * H) * 2 + (3 * H + 1) * 4))

    const = dict(pipeline_mode=pl.Buffered(1))  # constant blocks: single buffer

    out = pl.pallas_call(
        discriminator_kernel,
        out_shape=jax.ShapeDtypeStruct((n_tiles, 1, tile), jnp.float32),
        grid_spec=pl.GridSpec(
            grid=(n_tiles,),
            in_specs=[
                pl.BlockSpec((tile, D), lambda i: (i, 0)),            # x tile (f32)
                pl.BlockSpec((H, D), lambda i: (0, 0), **const),      # W1^T (bf16)
                pl.BlockSpec((H, 1), lambda i: (0, 0), **const),      # b1 column
                pl.BlockSpec((H, H), lambda i: (0, 0), **const),      # W2^T (bf16)
                pl.BlockSpec((H, 1), lambda i: (0, 0), **const),      # b2 column
                pl.BlockSpec((H, 1), lambda i: (0, 0), **const),      # w3 column
                pl.BlockSpec((1, 1), lambda i: (0, 0), **const),      # b3 scalar
            ],
            out_specs=pl.BlockSpec((1, 1, tile), lambda i: (i, 0, 0)),  # lane-dense row
        ),
        compiler_params=pltpu.CompilerParams(
            dimension_semantics=("parallel",)),
        cost_estimate=cost,
    )(x, w1t, b1c, w2t, b2c, w3c, b3c)

    # (n_tiles, 1, tile) is contiguous in batch order -> (B, 1).
    return out.reshape(B_pad, 1)[:B]


def init_params(key, input_shape, hidden=256):
    """Deterministic synthetic parameters (PyTorch-like uniform fan-in init)."""
    ks = jax.random.split(key, 6)

    def lin(kw, kb, fan_in, fan_out):
        bound = 1.0 / jnp.sqrt(fan_in)
        w = jax.random.uniform(kw, (fan_in, fan_out), jnp.float32, -bound, bound)
        b = jax.random.uniform(kb, (1, fan_out), jnp.float32, -bound, bound)
        return w, b

    w1, b1 = lin(ks[0], ks[1], input_shape, hidden)
    w2, b2 = lin(ks[2], ks[3], hidden, hidden)
    w3, b3 = lin(ks[4], ks[5], hidden, 1)
    return (w1, b1, w2, b2, w3, b3)


def reference_forward(x, params):
    w1, b1, w2, b2, w3, b3 = params
    h1 = _leaky_relu(x @ w1 + b1)
    h2 = _leaky_relu(h1 @ w2 + b2)
    return jax.nn.sigmoid(h2 @ w3 + b3)


if __name__ == "__main__":
    key = jax.random.PRNGKey(0)
    kx, kp = jax.random.split(key)

    batch = 8
    input_shape = 128  # flattened feature vector fed to the discriminator

    x = jax.random.normal(kx, (batch, input_shape), dtype=jnp.float32)
    params = init_params(kp, input_shape)

    out = discriminator_forward(x, params)
    out = jax.block_until_ready(out)

    ref = reference_forward(x, params)
    assert out.shape == (batch, 1)
    # bf16 matmul operands -> looser tolerance than pure f32.
    assert jnp.allclose(out, ref, atol=2e-2, rtol=2e-2), "mismatch vs reference"

    print("KERNEL_OK")
</pallas_src>

<mosaic_0001>
module attributes {stable_mosaic.version = 11 : i64} {
  func.func @discriminator_kernel(%arg0: i32, %arg1: memref<8x128xf32, #tpu.memory_space<vmem>>, %arg2: memref<256x128xbf16, #tpu.memory_space<vmem>>, %arg3: memref<256x1xf32, #tpu.memory_space<vmem>>, %arg4: memref<256x256xbf16, #tpu.memory_space<vmem>>, %arg5: memref<256x1xf32, #tpu.memory_space<vmem>>, %arg6: memref<256x1xf32, #tpu.memory_space<vmem>>, %arg7: memref<1x1xf32, #tpu.memory_space<vmem>>, %arg8: memref<1x1x8xf32, #tpu.memory_space<vmem>>) attributes {dimension_semantics = [#tpu.dimension_semantics<parallel>], iteration_bounds = array<i64: 1>, scalar_prefetch = 0 : i64, scratch_operands = 0 : i64, tpu.core_type = #tpu.core_type<tc>, window_params = [{transform_indices = @transform_0, window_bounds = array<i64: 8, 128>}, {pipeline_mode = #tpu.pipeline_mode<synchronous>, transform_indices = @transform_1, window_bounds = array<i64: 256, 128>}, {pipeline_mode = #tpu.pipeline_mode<synchronous>, transform_indices = @transform_2, window_bounds = array<i64: 256, 1>}, {pipeline_mode = #tpu.pipeline_mode<synchronous>, transform_indices = @transform_3, window_bounds = array<i64: 256, 256>}, {pipeline_mode = #tpu.pipeline_mode<synchronous>, transform_indices = @transform_4, window_bounds = array<i64: 256, 1>}, {pipeline_mode = #tpu.pipeline_mode<synchronous>, transform_indices = @transform_5, window_bounds = array<i64: 256, 1>}, {pipeline_mode = #tpu.pipeline_mode<synchronous>, transform_indices = @transform_6, window_bounds = array<i64: 1, 1>}, {transform_indices = @transform_7, window_bounds = array<i64: 1, 1, 8>}]} {
    %c0 = arith.constant 0 : index
    %c0_0 = arith.constant 0 : index
    %0 = vector.load %arg1[%c0, %c0_0] : memref<8x128xf32, #tpu.memory_space<vmem>>, vector<8x128xf32>
    %1 = tpu.transpose %0, [1, 0] : vector<8x128xf32> -> vector<128x8xf32>
    %c0_1 = arith.constant 0 : index
    %c0_2 = arith.constant 0 : index
    %2 = vector.load %arg2[%c0_1, %c0_2] : memref<256x128xbf16, #tpu.memory_space<vmem>>, vector<256x128xbf16>
    %3 = arith.truncf %1 : vector<128x8xf32> to vector<128x8xbf16>
    %cst = arith.constant dense<0.000000e+00> : vector<256x8xf32>
    %4 = tpu.matmul %2, %3, %cst {dimension_numbers = #tpu.dot_dimension_numbers<[1], [0], [0], [1], [0, 0, 1, 1], [], []>} : vector<256x128xbf16>, vector<128x8xbf16>, vector<256x8xf32> -> vector<256x8xf32>
    %c0_3 = arith.constant 0 : index
    %c0_4 = arith.constant 0 : index
    %5 = vector.load %arg3[%c0_3, %c0_4] : memref<256x1xf32, #tpu.memory_space<vmem>>, vector<256x1xf32>
    %6 = vector.broadcast %5 : vector<256x1xf32> to vector<256x8xf32>
    %7 = arith.addf %4, %6 : vector<256x8xf32>
    %cst_5 = arith.constant 0.000000e+00 : f32
    %8 = vector.broadcast %cst_5 : f32 to vector<256x8xf32>
    %9 = arith.cmpf ogt, %7, %8 : vector<256x8xf32>
    %cst_6 = arith.constant 1.000000e-01 : f32
    %10 = vector.broadcast %cst_6 : f32 to vector<256x8xf32>
    %11 = arith.mulf %10, %7 : vector<256x8xf32>
    %12 = arith.select %9, %7, %11 : vector<256x8xi1>, vector<256x8xf32>
    %c0_7 = arith.constant 0 : index
    %c0_8 = arith.constant 0 : index
    %13 = vector.load %arg4[%c0_7, %c0_8] : memref<256x256xbf16, #tpu.memory_space<vmem>>, vector<256x256xbf16>
    %14 = arith.truncf %12 : vector<256x8xf32> to vector<256x8xbf16>
    %cst_9 = arith.constant dense<0.000000e+00> : vector<256x8xf32>
    %15 = tpu.matmul %13, %14, %cst_9 {dimension_numbers = #tpu.dot_dimension_numbers<[1], [0], [0], [1], [0, 0, 1, 1], [], []>} : vector<256x256xbf16>, vector<256x8xbf16>, vector<256x8xf32> -> vector<256x8xf32>
    %c0_10 = arith.constant 0 : index
    %c0_11 = arith.constant 0 : index
    %16 = vector.load %arg5[%c0_10, %c0_11] : memref<256x1xf32, #tpu.memory_space<vmem>>, vector<256x1xf32>
    %17 = vector.broadcast %16 : vector<256x1xf32> to vector<256x8xf32>
    %18 = arith.addf %15, %17 : vector<256x8xf32>
    %cst_12 = arith.constant 0.000000e+00 : f32
    %19 = vector.broadcast %cst_12 : f32 to vector<256x8xf32>
    %20 = arith.cmpf ogt, %18, %19 : vector<256x8xf32>
    %cst_13 = arith.constant 1.000000e-01 : f32
    %21 = vector.broadcast %cst_13 : f32 to vector<256x8xf32>
    %22 = arith.mulf %21, %18 : vector<256x8xf32>
    %23 = arith.select %20, %18, %22 : vector<256x8xi1>, vector<256x8xf32>
    %c0_14 = arith.constant 0 : index
    %c0_15 = arith.constant 0 : index
    %24 = vector.load %arg6[%c0_14, %c0_15] : memref<256x1xf32, #tpu.memory_space<vmem>>, vector<256x1xf32>
    %25 = vector.broadcast %24 : vector<256x1xf32> to vector<256x8xf32>
    %26 = arith.mulf %23, %25 : vector<256x8xf32>
    %cst_16 = arith.constant dense<0.000000e+00> : vector<8xf32>
    %27 = vector.multi_reduction <add>, %26, %cst_16 [0] : vector<256x8xf32> to vector<8xf32>
    %28 = vector.shape_cast %27 : vector<8xf32> to vector<1x8xf32>
    %c0_17 = arith.constant 0 : index
    %c0_18 = arith.constant 0 : index
    %29 = vector.load %arg7[%c0_17, %c0_18] : memref<1x1xf32, #tpu.memory_space<vmem>>, vector<1x1xf32>
    %30 = vector.broadcast %29 : vector<1x1xf32> to vector<1x8xf32>
    %31 = arith.addf %28, %30 : vector<1x8xf32>
    %32 = arith.negf %31 : vector<1x8xf32>
    %33 = math.exp %32 : vector<1x8xf32>
    %cst_19 = arith.constant 1.000000e+00 : f32
    %34 = vector.broadcast %cst_19 : f32 to vector<1x8xf32>
    %35 = arith.addf %34, %33 : vector<1x8xf32>
    %36 = arith.divf %34, %35 : vector<1x8xf32>
    %c0_20 = arith.constant 0 : index
    %c0_21 = arith.constant 0 : index
    %c0_22 = arith.constant 0 : index
    %37 = vector.load %arg8[%c0_20, %c0_21, %c0_22] : memref<1x1x8xf32, #tpu.memory_space<vmem>>, vector<1x1x8xf32>
    %38 = vector.shape_cast %37 : vector<1x1x8xf32> to vector<1x8xf32>
    %39 = vector.shape_cast %36 : vector<1x8xf32> to vector<1x1x8xf32>
    tpu.vector_store %arg8[%c0_20, %c0_21, %c0_22], %39 {strides = array<i32>} : memref<1x1x8xf32, #tpu.memory_space<vmem>>, vector<1x1x8xf32>,
    return
  }
  func.func @transform_0(%arg0: i32) -> (i32, i32) {
    %c0_i32 = arith.constant 0 : i32
    %c0_i32_0 = arith.constant 0 : i32
    return %arg0, %c0_i32 : i32, i32
  }
  func.func @transform_1(%arg0: i32) -> (i32, i32) {
    %c0_i32 = arith.constant 0 : i32
    %c0_i32_0 = arith.constant 0 : i32
    %c0_i32_1 = arith.constant 0 : i32
    return %c0_i32, %c0_i32_0 : i32, i32
  }
  func.func @transform_2(%arg0: i32) -> (i32, i32) {
    %c0_i32 = arith.constant 0 : i32
    %c0_i32_0 = arith.constant 0 : i32
    %c0_i32_1 = arith.constant 0 : i32
    return %c0_i32, %c0_i32_0 : i32, i32
  }
  func.func @transform_3(%arg0: i32) -> (i32, i32) {
    %c0_i32 = arith.constant 0 : i32
    %c0_i32_0 = arith.constant 0 : i32
    %c0_i32_1 = arith.constant 0 : i32
    return %c0_i32, %c0_i32_0 : i32, i32
  }
  func.func @transform_4(%arg0: i32) -> (i32, i32) {
    %c0_i32 = arith.constant 0 : i32
    %c0_i32_0 = arith.constant 0 : i32
    %c0_i32_1 = arith.constant 0 : i32
    return %c0_i32, %c0_i32_0 : i32, i32
  }
  func.func @transform_5(%arg0: i32) -> (i32, i32) {
    %c0_i32 = arith.constant 0 : i32
    %c0_i32_0 = arith.constant 0 : i32
    %c0_i32_1 = arith.constant 0 : i32
    return %c0_i32, %c0_i32_0 : i32, i32
  }
  func.func @transform_6(%arg0: i32) -> (i32, i32) {
    %c0_i32 = arith.constant 0 : i32
    %c0_i32_0 = arith.constant 0 : i32
    %c0_i32_1 = arith.constant 0 : i32
    return %c0_i32, %c0_i32_0 : i32, i32
  }
  func.func @transform_7(%arg0: i32) -> (i32, i32, i32) {
    %c0_i32 = arith.constant 0 : i32
    %c0_i32_0 = arith.constant 0 : i32
    %c0_i32_1 = arith.constant 0 : i32
    return %arg0, %c0_i32, %c0_i32_0 : i32, i32, i32
  }
}

</mosaic_0001>

<bundles_post_ra>
// kernel: tpu_custom_call.1
= control target key start
LH: loop header
LB: loop body
LE: loop exit
PB: predicated region body
PF: predicated region fallthrough
CT: control target
= control target key end

     0   :  { %s2742_s0 = inlined_call_operand.vmem [shape: f32[8,128], index: 0, kind: input, shape index: {}]   ;;  %s2743_s1 = inlined_call_operand.vmem [shape: bf16[256,128], index: 1, kind: input, shape index: {}]   ;;  %s2744_s2 = inlined_call_operand.vmem [shape: f32[256,1], index: 2, kind: input, shape index: {}]   ;;  %s2745_s3 = inlined_call_operand.vmem [shape: bf16[256,256], index: 3, kind: input, shape index: {}]   ;;  %s2746_s4 = inlined_call_operand.vmem [shape: f32[256,1], index: 4, kind: input, shape index: {}]   ;;  %s2747_s5 = inlined_call_operand.vmem [shape: f32[256,1], index: 5, kind: input, shape index: {}]   ;;  %s2748_s6 = inlined_call_operand.<no memory space> [shape: f32[1,1], index: 6, kind: input, shape index: {}]   ;;  %s2749_s7 = inlined_call_operand.hbm [shape: f32[1,1,8], index: 7, kind: output, shape index: {}]  }
   0x1   :  { %v12_v0 = vstv %s2748_s6 }
   0x2   :  { %13 = vst [vmem:[#allocation2] sm:$0x1] %v12_v0 }
   0x3   :  { %v30_v1 = vld [vmem:[%s2742_s0] sm:$0xff]  ;;  %v120_v2 = vld [vmem:[%s2744_s2 + $0x88] sm:$0xff]  ;;  %v1978_v3 = vmov 0   ;;  %v121_v6 = vld [vmem:[%s2744_s2 + $0x90] sm:$0xff] }
   0x4   :  { %31 = vxpose.xlu0.b32.start.end [1/1] (short) %v30_v1, 128  ;;  %1885 = vset.pattern.permute.xlu1 %v1978_v3  ;;  %v103_v4 = vld [vmem:[%s2744_s2] sm:$0xff]  ;;  %v104_v5 = vld [vmem:[%s2744_s2 + $0x8] sm:$0xff]  ;;  %v122_v7 = vld [vmem:[%s2744_s2 + $0x98] sm:$0xff] }
   0x5   :  { %222 = vperm.xlu1 %1885, %v120_v2   ;;  %v105_v8 = vld [vmem:[%s2744_s2 + $0x10] sm:$0xff]  ;;  %v106_v9 = vld [vmem:[%s2744_s2 + $0x18] sm:$0xff]  ;;  %v123_v10 = vld [vmem:[%s2744_s2 + $0xa0] sm:$0xff] }
   0x6   :  { %v124_v11 = vld [vmem:[%s2744_s2 + $0xa8] sm:$0xff]  ;;  %v107_v12 = vld [vmem:[%s2744_s2 + $0x20] sm:$0xff] }
   0x9   :  { %137 = vperm.xlu1 %1885, %v103_v4  }
   0xd   :  { %142 = vperm.xlu1 %1885, %v104_v5  }
  0x11   :  { %227 = vperm.xlu1 %1885, %v121_v6  }
  0x15   :  { %232 = vperm.xlu1 %1885, %v122_v7  }
  0x19   :  { %147 = vperm.xlu1 %1885, %v105_v8  }
  0x1d   :  { %152 = vperm.xlu1 %1885, %v106_v9  }
  0x21   :  { %237 = vperm.xlu1 %1885, %v123_v10  }
  0x25   :  { %242 = vperm.xlu1 %1885, %v124_v11  }
  0x26   :  { %14 = vsyncpa [#allocation4], 0  ;;  %v108_v13 = vld [vmem:[%s2744_s2 + $0x28] sm:$0xff]  ;;  %v125_v14 = vld [vmem:[%s2744_s2 + $0xb0] sm:$0xff] }
  0x27   :  { %v126_v15 = vld [vmem:[%s2744_s2 + $0xb8] sm:$0xff]  ;;  %v109_v16 = vld [vmem:[%s2744_s2 + $0x30] sm:$0xff]  ;;  %v127_v18 = vld [vmem:[%s2744_s2 + $0xc0] sm:$0xff] }
  0x28   :  { %v110_v17 = vld [vmem:[%s2744_s2 + $0x38] sm:$0xff]  ;;  %v128_v19 = vld [vmem:[%s2744_s2 + $0xc8] sm:$0xff]  ;;  %v1886_v20 = vld [vmem:[%s2743_s1] sm:$0xff]  }
  0x29   :  { %157 = vperm.xlu1 %1885, %v107_v12   ;;  %v111_v21 = vld [vmem:[%s2744_s2 + $0x40] sm:$0xff]  ;;  %1833 = vmatprep.mubr.bf16.mxu0 %v1886_v20  ;;  %v112_v22 = vld [vmem:[%s2744_s2 + $0x48] sm:$0xff]  ;;  %v129_v23 = vld [vmem:[%s2744_s2 + $0xd0] sm:$0xff] }
  0x2a   :  { %v130_v24 = vld [vmem:[%s2744_s2 + $0xd8] sm:$0xff]  ;;  %v113_v25 = vld [vmem:[%s2744_s2 + $0x50] sm:$0xff]  ;;  %v131_v27 = vld [vmem:[%s2744_s2 + $0xe0] sm:$0xff] }
  0x2b   :  { %v114_v26 = vld [vmem:[%s2744_s2 + $0x58] sm:$0xff]  ;;  %v132_v28 = vld [vmem:[%s2744_s2 + $0xe8] sm:$0xff]  ;;  %v115_v29 = vld [vmem:[%s2744_s2 + $0x60] sm:$0xff] }
  0x2c   :  { %v119_v30 = vld [vmem:[%s2744_s2 + $0x80] sm:$0xff]  ;;  %v116_v31 = vld [vmem:[%s2744_s2 + $0x68] sm:$0xff]  ;;  %v133_v32 = vld [vmem:[%s2744_s2 + $0xf0] sm:$0xff] }
  0x2d   :  { %162 = vperm.xlu1 %1885, %v108_v13   ;;  %1884 = vset.pattern.permute.xlu0 %v1978_v3  ;;  %v134_v33 = vld [vmem:[%s2744_s2 + $0xf8] sm:$0xff]  ;;  %v117_v34 = vld [vmem:[%s2744_s2 + $0x70] sm:$0xff]  ;;  %v696_v36 = vld [vmem:[%s2746_s4] sm:$0xff] }
  0x2e   :  { %v118_v35 = vld [vmem:[%s2744_s2 + $0x78] sm:$0xff]  ;;  %v697_v37 = vld [vmem:[%s2746_s4 + $0x8] sm:$0xff]  ;;  %v698_v38 = vld [vmem:[%s2746_s4 + $0x10] sm:$0xff] }
  0x2f   :  { %v699_v39 = vld [vmem:[%s2746_s4 + $0x18] sm:$0xff]  ;;  %v700_v40 = vld [vmem:[%s2746_s4 + $0x20] sm:$0xff]  ;;  %v701_v41 = vld [vmem:[%s2746_s4 + $0x28] sm:$0xff] }
  0x30   :  { %v702_v42 = vld [vmem:[%s2746_s4 + $0x30] sm:$0xff]  ;;  %v703_v43 = vld [vmem:[%s2746_s4 + $0x38] sm:$0xff]  ;;  %v704_v44 = vld [vmem:[%s2746_s4 + $0x40] sm:$0xff] }
  0x31   :  { %247 = vperm.xlu1 %1885, %v125_v14   ;;  %v705_v46 = vld [vmem:[%s2746_s4 + $0x48] sm:$0xff]  ;;  %v706_v47 = vld [vmem:[%s2746_s4 + $0x50] sm:$0xff]  ;;  %v707_v50 = vld [vmem:[%s2746_s4 + $0x58] sm:$0xff] }
  0x32   :  { %v708_v51 = vld [vmem:[%s2746_s4 + $0x60] sm:$0xff]  ;;  %v709_v53 = vld [vmem:[%s2746_s4 + $0x68] sm:$0xff]  ;;  %v710_v54 = vld [vmem:[%s2746_s4 + $0x70] sm:$0xff] }
  0x33   :  { %v711_v57 = vld [vmem:[%s2746_s4 + $0x78] sm:$0xff]  ;;  %v712_v58 = vld [vmem:[%s2746_s4 + $0x80] sm:$0xff]  ;;  %v713_v60 = vld [vmem:[%s2746_s4 + $0x88] sm:$0xff] }
  0x34   :  { %v714_v61 = vld [vmem:[%s2746_s4 + $0x90] sm:$0xff]  ;;  %v715_v0 = vld [vmem:[%s2746_s4 + $0x98] sm:$0xff]  ;;  %v716_v1 = vld [vmem:[%s2746_s4 + $0xa0] sm:$0xff] }
  0x35   :  { %252 = vperm.xlu1 %1885, %v126_v15   ;;  %v717_v3 = vld [vmem:[%s2746_s4 + $0xa8] sm:$0xff]  ;;  %v718_v4 = vld [vmem:[%s2746_s4 + $0xb0] sm:$0xff]  ;;  %v1305_v7 = vld [vmem:[%s2747_s5] sm:$0xff] }
  0x36   :  { %v1306_v8 = vld [vmem:[%s2747_s5 + $0x8] sm:$0xff]  ;;  %v1307_v10 = vld [vmem:[%s2747_s5 + $0x10] sm:$0xff]  ;;  %v1308_v11 = vld [vmem:[%s2747_s5 + $0x18] sm:$0xff] }
  0x37   :  { %v1309_v14 = vld [vmem:[%s2747_s5 + $0x20] sm:$0xff]  ;;  %v1310_v15 = vld [vmem:[%s2747_s5 + $0x28] sm:$0xff] }
  0x39   :  { %167 = vperm.xlu1 %1885, %v109_v16  }
  0x3d   :  { %172 = vperm.xlu1 %1885, %v110_v17   ;;  %v1311_v17 = vld [vmem:[%s2747_s5 + $0x30] sm:$0xff] }
  0x41   :  { %257 = vperm.xlu1 %1885, %v127_v18   ;;  %v1312_v18 = vld [vmem:[%s2747_s5 + $0x38] sm:$0xff] }
  0x45   :  { %262 = vperm.xlu1 %1885, %v128_v19  }
  0x49   :  { %177 = vperm.xlu1 %1885, %v111_v21   ;;  %v1313_v21 = vld [vmem:[%s2747_s5 + $0x40] sm:$0xff] }
  0x4d   :  { %182 = vperm.xlu1 %1885, %v112_v22   ;;  %v1314_v22 = vld [vmem:[%s2747_s5 + $0x48] sm:$0xff] }
  0x51   :  { %267 = vperm.xlu1 %1885, %v129_v23  }
  0x55   :  { %272 = vperm.xlu1 %1885, %v130_v24  }
  0x59   :  { %187 = vperm.xlu1 %1885, %v113_v25   ;;  %v1315_v25 = vld [vmem:[%s2747_s5 + $0x50] sm:$0xff] }
  0x5d   :  { %192 = vperm.xlu1 %1885, %v114_v26   ;;  %v1316_v26 = vld [vmem:[%s2747_s5 + $0x58] sm:$0xff] }
  0x61   :  { %277 = vperm.xlu1 %1885, %v131_v27  }
  0x65   :  { %282 = vperm.xlu1 %1885, %v132_v28  }
  0x69   :  { %197 = vperm.xlu1 %1885, %v115_v29   ;;  %217 = vperm.xlu0 %1884, %v119_v30   ;;  %v1317_v30 = vld [vmem:[%s2747_s5 + $0x60] sm:$0xff] }
  0x6d   :  { %202 = vperm.xlu1 %1885, %v116_v31   ;;  %287 = vperm.xlu0 %1884, %v133_v32   ;;  %v1318_v31 = vld [vmem:[%s2747_s5 + $0x68] sm:$0xff] }
  0x71   :  { %292 = vperm.xlu1 %1885, %v134_v33   ;;  %207 = vperm.xlu0 %1884, %v117_v34   ;;  %v1319_v33 = vld [vmem:[%s2747_s5 + $0x70] sm:$0xff]  ;;  %v1320_v34 = vld [vmem:[%s2747_s5 + $0x78] sm:$0xff] }
  0x75   :  { %212 = vperm.xlu1 %1885, %v118_v35   ;;  %730 = vperm.xlu0 %1884, %v696_v36  }
  0x79   :  { %735 = vperm.xlu1 %1885, %v697_v37   ;;  %740 = vperm.xlu0 %1884, %v698_v38   ;;  %v1321_v38 = vld [vmem:[%s2747_s5 + $0x80] sm:$0xff] }
  0x7d   :  { %745 = vperm.xlu1 %1885, %v699_v39   ;;  %750 = vperm.xlu0 %1884, %v700_v40   ;;  %v1322_v39 = vld [vmem:[%s2747_s5 + $0x88] sm:$0xff] }
  0x7e   :  { %v1887_v40 = vld [vmem:[%s2743_s1 + $0x8] sm:$0xff]  }
  0x81   :  { %755 = vperm.xlu1 %1885, %v701_v41   ;;  %760 = vperm.xlu0 %1884, %v702_v42   ;;  %v1888_v41 = vld [vmem:[%s2743_s1 + $0x10] sm:$0xff]  }
  0x84   :  { %v47_v45 = vpop.trf.xlu0  ;;  %v2224_v23 = vpop.permute.xlu1 %222 }
  0x85   :  { %765 = vperm.xlu1 %1885, %v703_v43   ;;  %770 = vperm.xlu0 %1884, %v704_v44   ;;  %v1323_v43 = vld [vmem:[%s2747_s5 + $0x90] sm:$0xff]  ;;  %v1324_v44 = vld [vmem:[%s2747_s5 + $0x98] sm:$0xff] }
  0x88   :  { %v48_v48 = vpop.trf.xlu0  ;;  %v2232_v28 = vpop.permute.xlu1 %137 }
  0x89   :  { %v95_v49 = vpack.c.bf16 %v48_v48, %v47_v45  ;;  %775 = vperm.xlu1 %1885, %v705_v46   ;;  %780 = vperm.xlu0 %1884, %v706_v47   ;;  %v1325_v45 = vld [vmem:[%s2747_s5 + $0xa0] sm:$0xff]  ;;  %v719_v46 = vld [vmem:[%s2746_s4 + $0xb8] sm:$0xff] }
  0x8a   :  { %v1889_v48 = vld [vmem:[%s2743_s1 + $0x18] sm:$0xff]  }
  0x8b   :  { %1817 = vmatprep.subr.bf16.mxu0 %v95_v49 }
  0x8c   :  { %1818 = vmatpush3.bf16.msra.mxu0 %v95_v49  ;;  %v49_v52 = vpop.trf.xlu0  ;;  %v2246_v35 = vpop.permute.xlu1 %142  ;;  %v1890_v49 = vld [vmem:[%s2743_s1 + $0x20] sm:$0xff]  }
  0x8d   :  { %785 = vperm.xlu1 %1885, %v707_v50   ;;  %790 = vperm.xlu0 %1884, %v708_v51   ;;  %v1326_v50 = vld [vmem:[%s2747_s5 + $0xa8] sm:$0xff]  ;;  %v720_v51 = vld [vmem:[%s2746_s4 + $0xc0] sm:$0xff] }
  0x90   :  { %v50_v55 = vpop.trf.xlu0  ;;  %v2260_v42 = vpop.permute.xlu1 %227 }
  0x91   :  { %v96_v56 = vpack.c.bf16 %v50_v55, %v49_v52  ;;  %795 = vperm.xlu1 %1885, %v709_v53   ;;  %800 = vperm.xlu0 %1884, %v710_v54   ;;  %v1327_v53 = vld [vmem:[%s2747_s5 + $0xb0] sm:$0xff]  ;;  %v721_v54 = vld [vmem:[%s2746_s4 + $0xc8] sm:$0xff] }
  0x92   :  { %v1891_v55 = vld [vmem:[%s2743_s1 + $0x28] sm:$0xff]  }
  0x93   :  { %1819 = vmatprep.subr.bf16.mxu0 %v96_v56 }
  0x94   :  { %1820 = vmatpush3.bf16.msra.mxu0 %v96_v56  ;;  %v51_v59 = vpop.trf.xlu0  ;;  %v2274_v47 = vpop.permute.xlu1 %232  ;;  %v1892_v56 = vld [vmem:[%s2743_s1 + $0x30] sm:$0xff]  }
  0x95   :  { %805 = vperm.xlu1 %1885, %v711_v57   ;;  %810 = vperm.xlu0 %1884, %v712_v58   ;;  %v1328_v57 = vld [vmem:[%s2747_s5 + $0xb8] sm:$0xff]  ;;  %v722_v58 = vld [vmem:[%s2746_s4 + $0xd0] sm:$0xff] }
  0x98   :  { %v52_v62 = vpop.trf.xlu0  ;;  %v2288_v52 = vpop.permute.xlu1 %147 }
  0x99   :  { %v97_v63 = vpack.c.bf16 %v52_v62, %v51_v59  ;;  %815 = vperm.xlu1 %1885, %v713_v60   ;;  %820 = vperm.xlu0 %1884, %v714_v61   ;;  %v1329_v60 = vld [vmem:[%s2747_s5 + $0xc0] sm:$0xff]  ;;  %v723_v61 = vld [vmem:[%s2746_s4 + $0xd8] sm:$0xff] }
  0x9a   :  { %v1893_v62 = vld [vmem:[%s2743_s1 + $0x38] sm:$0xff]  }
  0x9b   :  { %1821 = vmatprep.subr.bf16.mxu0 %v97_v63 }
  0x9c   :  { %1822 = vmatpush3.bf16.msra.mxu0 %v97_v63  ;;  %v53_v2 = vpop.trf.xlu0  ;;  %v2308_v59 = vpop.permute.xlu1 %152  ;;  %v1894_v63 = vld [vmem:[%s2743_s1 + $0x40] sm:$0xff]  }
  0x9d   :  { %825 = vperm.xlu1 %1885, %v715_v0   ;;  %830 = vperm.xlu0 %1884, %v716_v1   ;;  %v1330_v1 = vld [vmem:[%s2747_s5 + $0xc8] sm:$0xff] }
  0xa0   :  { %v54_v5 = vpop.trf.xlu0  ;;  %v2322_v0 = vpop.permute.xlu1 %237 }
  0xa1   :  { %v98_v6 = vpack.c.bf16 %v54_v5, %v53_v2  ;;  %835 = vperm.xlu1 %1885, %v717_v3   ;;  %840 = vperm.xlu0 %1884, %v718_v4   ;;  %v724_v2 = vld [vmem:[%s2746_s4 + $0xe0] sm:$0xff]  ;;  %v1331_v3 = vld [vmem:[%s2747_s5 + $0xd0] sm:$0xff]  ;;  %v725_v4 = vld [vmem:[%s2746_s4 + $0xe8] sm:$0xff] }
  0xa3   :  { %1823 = vmatprep.subr.bf16.mxu0 %v98_v6 }
  0xa4   :  { %1824 = vmatpush3.bf16.msra.mxu0 %v98_v6  ;;  %v55_v9 = vpop.trf.xlu0  ;;  %v2336_v5 = vpop.permute.xlu1 %242  ;;  %v1895_v6 = vld [vmem:[%s2743_s1 + $0x48] sm:$0xff]  }
  0xa5   :  { %1339 = vperm.xlu1 %1885, %v1305_v7   ;;  %1344 = vperm.xlu0 %1884, %v1306_v8   ;;  %v1896_v7 = vld [vmem:[%s2743_s1 + $0x50] sm:$0xff]   ;;  %v1332_v8 = vld [vmem:[%s2747_s5 + $0xd8] sm:$0xff] }
  0xa8   :  { %v56_v12 = vpop.trf.xlu0 }
  0xa9   :  { %v99_v13 = vpack.c.bf16 %v56_v12, %v55_v9  ;;  %1349 = vperm.xlu1 %1885, %v1307_v10   ;;  %1354 = vperm.xlu0 %1884, %v1308_v11   ;;  %v726_v9 = vld [vmem:[%s2746_s4 + $0xf0] sm:$0xff]  ;;  %v2350_v10 = vpop.permute.xlu1 %157  ;;  %v1333_v11 = vld [vmem:[%s2747_s5 + $0xe0] sm:$0xff]  ;;  %v727_v12 = vld [vmem:[%s2746_s4 + $0xf8] sm:$0xff] }
  0xab   :  { %1825 = vmatprep.subr.bf16.mxu0 %v99_v13 }
  0xac   :  { %1826 = vmatpush3.bf16.msra.mxu0 %v99_v13  ;;  %v57_v16 = vpop.trf.xlu0  ;;  %v1897_v13 = vld [vmem:[%s2743_s1 + $0x58] sm:$0xff]  }
  0xad   :  { %1359 = vperm.xlu1 %1885, %v1309_v14   ;;  %1364 = vperm.xlu0 %1884, %v1310_v15   ;;  %v1898_v14 = vld [vmem:[%s2743_s1 + $0x60] sm:$0xff]   ;;  %v1334_v15 = vld [vmem:[%s2747_s5 + $0xe8] sm:$0xff] }
  0xb0   :  { %v58_v19 = vpop.trf.xlu0 }
  0xb1   :  { %v100_v20 = vpack.c.bf16 %v58_v19, %v57_v16  ;;  %1369 = vperm.xlu1 %1885, %v1311_v17   ;;  %1374 = vperm.xlu0 %1884, %v1312_v18   ;;  %v1335_v16 = vld [vmem:[%s2747_s5 + $0xf0] sm:$0xff]  ;;  %v2370_v17 = vpop.permute.xlu1 %162  ;;  %v1336_v18 = vld [vmem:[%s2747_s5 + $0xf8] sm:$0xff]  ;;  %v1599_v19 = vld [vmem:[#allocation2] sm:$0x1] }
  0xb3   :  { %1827 = vmatprep.subr.bf16.mxu0 %v100_v20 }
  0xb4   :  { %1828 = vmatpush3.bf16.msra.mxu0 %v100_v20  ;;  %v59_v24 = vpop.trf.xlu0  ;;  %v1899_v20 = vld [vmem:[%s2743_s1 + $0x68] sm:$0xff]  }
  0xb5   :  { %1379 = vperm.xlu1 %1885, %v1313_v21   ;;  %1384 = vperm.xlu0 %1884, %v1314_v22   ;;  %v1900_v21 = vld [vmem:[%s2743_s1 + $0x70] sm:$0xff]   ;;  %v2381_v22 = vpop.permute.xlu1 %247 }
  0xb8   :  { %v60_v27 = vpop.trf.xlu0 }
  0xb9   :  { %v101_v29 = vpack.c.bf16 %v60_v27, %v59_v24  ;;  %1389 = vperm.xlu1 %1885, %v1315_v25   ;;  %1394 = vperm.xlu0 %1884, %v1316_v26   ;;  %v1901_v24 = vld [vmem:[%s2743_s1 + $0x78] sm:$0xff]   ;;  %v2386_v25 = vpop.permute.xlu1 %252 }
  0xbb   :  { %1829 = vmatprep.subr.bf16.mxu0 %v101_v29 }
  0xbc   :  { %1830 = vmatpush3.bf16.msra.mxu0 %v101_v29  ;;  %v61_v32 = vpop.trf.xlu0  ;;  %v1904_v29 = vld [vmem:[%s2745_s3 + $0x4] ss:$8 sps:$4 sm:$0xff]  }
  0xbd   :  { %1399 = vperm.xlu1 %1885, %v1317_v30   ;;  %1404 = vperm.xlu0 %1884, %v1318_v31   ;;  %v168_v26 = vpop.permute.xlu1 %167  ;;  %v1907_v30 = vld [vmem:[%s2745_s3 + $0x44] ss:$8 sps:$4 sm:$0xff]  }
  0xbe   :  { %1112 = vmatprep.mubr.bf16.mxu1 %v1907_v30 }
  0xc0   :  { %v62_v36 = vpop.trf.xlu0 }
  0xc1   :  { %v102_v37 = vpack.c.bf16 %v62_v36, %v61_v32  ;;  %1409 = vperm.xlu1 %1885, %v1319_v33   ;;  %1414 = vperm.xlu0 %1884, %v1320_v34   ;;  %v173_v27 = vpop.permute.xlu1 %172 }
  0xc3   :  { %1831 = vmatprep.subr.bf16.mxu0 %v102_v37 }
  0xc4   :  { %1832 = vmatpush3.bf16.msra.mxu0 %v102_v37 }
  0xc5   :  { %1419 = vperm.xlu1 %1885, %v1321_v38   ;;  %1424 = vperm.xlu0 %1884, %v1322_v39   ;;  %v2394_v31 = vpop.permute.xlu1 %257 }
  0xc7   :  { %1834 = vmatmul.mubr.bf16.vlgmr.msra.gmra.mrb[0].mxu0 %v1887_v40 }
  0xc8   :  { %1837 = vmatprep.mubr.bf16.mxu0 %v1888_v41 }
  0xc9   :  { %1429 = vperm.xlu1 %1885, %v1323_v43   ;;  %1434 = vperm.xlu0 %1884, %v1324_v44   ;;  %v2396_v32 = vpop.permute.xlu1 %262 }
  0xcd   :  { %1439 = vperm.xlu1 %1885, %v1325_v45   ;;  %845 = vperm.xlu0 %1884, %v719_v46   ;;  %v178_v33 = vpop.permute.xlu1 %177 }
  0xcf   :  { %1838 = vmatmul.mubr.bf16.gmra.mrb[4].mxu0 %v1889_v48 }
  0xd0   :  { %1841 = vmatprep.mubr.bf16.mxu0 %v1890_v49 }
  0xd1   :  { %1444 = vperm.xlu1 %1885, %v1326_v50   ;;  %850 = vperm.xlu0 %1884, %v720_v51   ;;  %v2398_v34 = vpop.permute.xlu1 %182 }
  0xd5   :  { %1449 = vperm.xlu1 %1885, %v1327_v53   ;;  %855 = vperm.xlu0 %1884, %v721_v54   ;;  %v2400_v36 = vpop.permute.xlu1 %267 }
  0xd7   :  { %1842 = vmatmul.mubr.bf16.gmra.mrb[8].mxu0 %v1891_v55 }
  0xd8   :  { %1845 = vmatprep.mubr.bf16.mxu0 %v1892_v56 }
  0xd9   :  { %1454 = vperm.xlu1 %1885, %v1328_v57   ;;  %860 = vperm.xlu0 %1884, %v722_v58   ;;  %v2402_v37 = vpop.permute.xlu1 %272 }
  0xdd   :  { %1459 = vperm.xlu1 %1885, %v1329_v60   ;;  %865 = vperm.xlu0 %1884, %v723_v61   ;;  %v188_v38 = vpop.permute.xlu1 %187 }
  0xdf   :  { %1846 = vmatmul.mubr.bf16.gmra.mrb[12].mxu0 %v1893_v62 }
  0xe0   :  { %1849 = vmatprep.mubr.bf16.mxu0 %v1894_v63 }
  0xe1   :  { %1464 = vperm.xlu1 %1885, %v1330_v1   ;;  %870 = vperm.xlu0 %1884, %v724_v2   ;;  %v193_v39 = vpop.permute.xlu1 %192 }
  0xe5   :  { %1469 = vperm.xlu1 %1885, %v1331_v3   ;;  %875 = vperm.xlu0 %1884, %v725_v4   ;;  %v2404_v40 = vpop.permute.xlu1 %277 }
  0xe7   :  { %1850 = vmatmul.mubr.bf16.gmra.mrb[16].mxu0 %v1895_v6 }
  0xe8   :  { %1853 = vmatprep.mubr.bf16.mxu0 %v1896_v7  ;;  %v2417_v7 = vpop.permute.xlu0 %217 }
  0xe9   :  { %1474 = vperm.xlu1 %1885, %v1332_v8   ;;  %880 = vperm.xlu0 %1884, %v726_v9   ;;  %v2407_v45 = vpop.permute.xlu1 %282 }
  0xed   :  { %1479 = vperm.xlu1 %1885, %v1333_v11   ;;  %885 = vperm.xlu0 %1884, %v727_v12   ;;  %v198_v58 = vpop.permute.xlu1 %197 }
  0xef   :  { %1854 = vmatmul.mubr.bf16.gmra.mrb[20].mxu0 %v1897_v13 }
  0xf0   :  { %1857 = vmatprep.mubr.bf16.mxu0 %v1898_v14 }
  0xf1   :  { %1484 = vperm.xlu1 %1885, %v1334_v15   ;;  %1489 = vperm.xlu0 %1884, %v1335_v16   ;;  %v203_v12 = vpop.permute.xlu1 %202 }
  0xf5   :  { %1494 = vperm.xlu1 %1885, %v1336_v18   ;;  %1602 = vperm.xlu0 %1884, %v1599_v19  }
  0xf7   :  { %1858 = vmatmul.mubr.bf16.gmra.mrb[24].mxu0 %v1899_v20 }
  0xf8   :  { %1861 = vmatprep.mubr.bf16.mxu0 %v1900_v21 }
  0xff   :  { %1862 = vmatmul.mubr.bf16.gmra.mrb[28].mxu0 %v1901_v24 }
 0x100   :  { %1080 = vmatprep.mubr.bf16.mxu0 %v1904_v29 }
 0x19a   :  { %v1835_v41 = vpop.f32.mrb[0].mxu0 }
 0x19b   :  { %v434_v43 = vadd.f32 %v1835_v41, %v2288_v52  ;;  %v425_v44 = vpop.f32.mrb[1].mxu0 }
 0x19c   :  { %v426_v46 = vadd.f32 %v425_v44, %v2232_v28  ;;  %v1836_v48 = vpop.f32.mrb[2].mxu0 }
 0x19d   :  { %v586_v49 = vmul.f32 0.1, %v434_v43  ;;  %v437_v50 = vadd.f32 %v1836_v48, %v2308_v59  ;;  %v428_v51 = vpop.f32.mrb[3].mxu0  ;;  %vm554_vm0 = vcmp.gt.f32.partialorder %v434_v43, 0.0 }
 0x19e   :  { %v584_v53 = vmul.f32 0.1, %v426_v46  ;;  %v429_v54 = vadd.f32 %v428_v51, %v2246_v35  ;;  %vm552_vm1 = vcmp.gt.f32.partialorder %v426_v46, 0.0 }
 0x19f   :  { %vm555_vm2 = vcmp.gt.f32.partialorder %v437_v50, 0.0  ;;  %v587_v55 = vmul.f32 0.1, %v437_v50  ;;  %v618_v52 = vsel %vm554_vm0, %v434_v43, %v586_v49  ;;  %v2426_v43 = vpop.permute.xlu1 %292 }
 0x1a0   :  { %vm553_vm3 = vcmp.gt.f32.partialorder %v429_v54, 0.0  ;;  %v585_v56 = vmul.f32 0.1, %v429_v54  ;;  %v616_v60 = vsel %vm552_vm1, %v426_v46, %v584_v53 }
 0x1a1   :  { %v619_v57 = vsel %vm555_vm2, %v437_v50, %v587_v55 }
 0x1a2   :  { %v2412_v61 = vpack.c.bf16 %v619_v57, %v618_v52  ;;  %v617_v28 = vsel %vm553_vm3, %v429_v54, %v585_v56  ;;  %v1839_v62 = vpop.f32.mrb[4].mxu0 }
 0x1a3   :  { %v2414_v63 = vpack.c.bf16 %v617_v28, %v616_v60  ;;  %v450_v59 = vadd.f32 %v1839_v62, %v168_v26  ;;  %v441_v1 = vpop.f32.mrb[5].mxu0  ;;  %v2424_v26 = vpop.permute.xlu0 %287 }
 0x1a4   :  { %v442_v2 = vadd.f32 %v441_v1, %v2350_v10  ;;  %v1840_v35 = vpop.f32.mrb[6].mxu0  ;;  %v213_v57 = vpop.permute.xlu1 %212 }
 0x1a5   :  { %v590_v3 = vmul.f32 0.1, %v450_v59  ;;  %v453_v4 = vadd.f32 %v1840_v35, %v173_v27  ;;  %v444_v6 = vpop.f32.mrb[7].mxu0  ;;  %vm558_vm4 = vcmp.gt.f32.partialorder %v450_v59, 0.0 }
 0x1a6   :  { %v588_v8 = vmul.f32 0.1, %v442_v2  ;;  %v445_v9 = vadd.f32 %v444_v6, %v2370_v17  ;;  %vm556_vm5 = vcmp.gt.f32.partialorder %v442_v2, 0.0 }
 0x1a7   :  { %vm559_vm6 = vcmp.gt.f32.partialorder %v453_v4, 0.0  ;;  %v591_v11 = vmul.f32 0.1, %v453_v4  ;;  %v622_v14 = vsel %vm558_vm4, %v450_v59, %v590_v3  ;;  %v208_v51 = vpop.permute.xlu0 %207 }
 0x1a8   :  { %vm557_vm7 = vcmp.gt.f32.partialorder %v445_v9, 0.0  ;;  %v589_v13 = vmul.f32 0.1, %v445_v9  ;;  %v620_v16 = vsel %vm556_vm5, %v442_v2, %v588_v8 }
 0x1a9   :  { %v623_v15 = vsel %vm559_vm6, %v453_v4, %v591_v11 }
 0x1aa   :  { %v2420_v10 = vpack.c.bf16 %v623_v15, %v622_v14  ;;  %v621_v18 = vsel %vm557_vm7, %v445_v9, %v589_v13  ;;  %v1843_v19 = vpop.f32.mrb[8].mxu0 }
 0x1ab   :  { %v2422_v20 = vpack.c.bf16 %v621_v18, %v620_v16  ;;  %v466_v21 = vadd.f32 %v1843_v19, %v188_v38  ;;  %v457_v24 = vpop.f32.mrb[9].mxu0 }
 0x1ac   :  { %v458_v17 = vadd.f32 %v457_v24, %v178_v33  ;;  %v1844_v27 = vpop.f32.mrb[10].mxu0 }
 0x1ad   :  { %v594_v29 = vmul.f32 0.1, %v466_v21  ;;  %v469_v30 = vadd.f32 %v1844_v27, %v193_v39  ;;  %v460_v41 = vpop.f32.mrb[11].mxu0  ;;  %vm562_vm8 = vcmp.gt.f32.partialorder %v466_v21, 0.0 }
 0x1ae   :  { %v592_v44 = vmul.f32 0.1, %v458_v17  ;;  %v461_v46 = vadd.f32 %v460_v41, %v2398_v34  ;;  %vm560_vm9 = vcmp.gt.f32.partialorder %v458_v17, 0.0 }
 0x1af   :  { %vm563_vm10 = vcmp.gt.f32.partialorder %v469_v30, 0.0  ;;  %v595_v48 = vmul.f32 0.1, %v469_v30  ;;  %v626_v38 = vsel %vm562_vm8, %v466_v21, %v594_v29 }
 0x1b0   :  { %vm561_vm11 = vcmp.gt.f32.partialorder %v461_v46, 0.0  ;;  %v593_v49 = vmul.f32 0.1, %v461_v46  ;;  %v624_v53 = vsel %vm560_vm9, %v458_v17, %v592_v44 }
 0x1b1   :  { %v627_v50 = vsel %vm563_vm10, %v469_v30, %v595_v48 }
 0x1b2   :  { %v2429_v33 = vpack.c.bf16 %v627_v50, %v626_v38  ;;  %v625_v54 = vsel %vm561_vm11, %v461_v46, %v593_v49  ;;  %v1847_v39 = vpop.f32.mrb[12].mxu0 }
 0x1b3   :  { %v2431_v55 = vpack.c.bf16 %v625_v54, %v624_v53  ;;  %v482_v56 = vadd.f32 %v1847_v39, %v208_v51  ;;  %v473_v52 = vpop.f32.mrb[13].mxu0 }
 0x1b4   :  { %v474_v60 = vadd.f32 %v473_v52, %v198_v58  ;;  %v1848_v34 = vpop.f32.mrb[14].mxu0 }
 0x1b5   :  { %v598_v28 = vmul.f32 0.1, %v482_v56  ;;  %v485_v62 = vadd.f32 %v1848_v34, %v213_v57  ;;  %v476_v59 = vpop.f32.mrb[15].mxu0  ;;  %vm566_vm12 = vcmp.gt.f32.partialorder %v482_v56, 0.0 }
 0x1b6   :  { %v596_v1 = vmul.f32 0.1, %v474_v60  ;;  %v477_v2 = vadd.f32 %v476_v59, %v203_v12  ;;  %vm564_vm13 = vcmp.gt.f32.partialorder %v474_v60, 0.0 }
 0x1b7   :  { %vm567_vm14 = vcmp.gt.f32.partialorder %v485_v62, 0.0  ;;  %v599_v35 = vmul.f32 0.1, %v485_v62  ;;  %v630_v4 = vsel %vm566_vm12, %v482_v56, %v598_v28 }
 0x1b8   :  { %vm565_vm15 = vcmp.gt.f32.partialorder %v477_v2, 0.0  ;;  %v597_v3 = vmul.f32 0.1, %v477_v2  ;;  %v628_v8 = vsel %vm564_vm13, %v474_v60, %v596_v1 }
 0x1b9   :  { %v631_v6 = vsel %vm567_vm14, %v485_v62, %v599_v35 }
 0x1ba   :  { %v2433_v9 = vpack.c.bf16 %v631_v6, %v630_v4  ;;  %v629_v11 = vsel %vm565_vm15, %v477_v2, %v597_v3  ;;  %v1851_v13 = vpop.f32.mrb[16].mxu0 }
 0x1bb   :  { %v2435_v58 = vpack.c.bf16 %v629_v11, %v628_v8  ;;  %v498_v14 = vadd.f32 %v1851_v13, %v2260_v42  ;;  %v489_v15 = vpop.f32.mrb[17].mxu0 }
 0x1bc   :  { %v490_v16 = vadd.f32 %v489_v15, %v2417_v7  ;;  %v1852_v12 = vpop.f32.mrb[18].mxu0 }
 0x1bd   :  { %v602_v18 = vmul.f32 0.1, %v498_v14  ;;  %v501_v19 = vadd.f32 %v1852_v12, %v2274_v47  ;;  %v492_v21 = vpop.f32.mrb[19].mxu0  ;;  %vm570_vm0 = vcmp.gt.f32.partialorder %v498_v14, 0.0 }
 0x1be   :  { %v600_v24 = vmul.f32 0.1, %v490_v16  ;;  %v493_v17 = vadd.f32 %v492_v21, %v2224_v23  ;;  %vm568_vm1 = vcmp.gt.f32.partialorder %v490_v16, 0.0 }
 0x1bf   :  { %vm571_vm2 = vcmp.gt.f32.partialorder %v501_v19, 0.0  ;;  %v603_v27 = vmul.f32 0.1, %v501_v19  ;;  %v634_v30 = vsel %vm570_vm0, %v498_v14, %v602_v18 }
 0x1c0   :  { %vm569_vm3 = vcmp.gt.f32.partialorder %v493_v17, 0.0  ;;  %v601_v29 = vmul.f32 0.1, %v493_v17  ;;  %v632_v44 = vsel %vm568_vm1, %v490_v16, %v600_v24 }
 0x1c1   :  { %v635_v41 = vsel %vm571_vm2, %v501_v19, %v603_v27  ;;  %vm1529_vm2 = vcmask 64512  }
 0x1c2   :  { %v1855_v42 = vpop.f32.mrb[20].mxu0  ;;  %v633_v46 = vsel %vm569_vm3, %v493_v17, %v601_v29  ;;  %v689_v7 = vpack.c.bf16 %v635_v41, %v634_v30  ;;  %v1908_v30 = vld [vmem:[%s2745_s3 + $0x14] ss:$8 sps:$4 sm:$0xff]   ;;  %v1912_v41 = vld [vmem:[%s2745_s3 + $0x10] ss:$8 sps:$4 sm:$0xff]  }
 0x1c3   :  { %v514_v48 = vadd.f32 %v1855_v42, %v2381_v22  ;;  %v505_v49 = vpop.f32.mrb[21].mxu0  ;;  %v688_v47 = vpack.c.bf16 %v633_v46, %v632_v44  ;;  %v1914_v42 = vld [vmem:[%s2745_s3 + $0x24] ss:$8 sps:$4 sm:$0xff]   ;;  %v1918_v46 = vld [vmem:[%s2745_s3 + $0x20] ss:$8 sps:$4 sm:$0xff]  }
 0x1c4   :  { %v506_v38 = vadd.f32 %v505_v49, %v2322_v0  ;;  %v1856_v50 = vpop.f32.mrb[22].mxu0  ;;  %v1916_v44 = vld [vmem:[%s2745_s3 + $0x64] ss:$8 sps:$4 sm:$0xff]   ;;  %v1922_v49 = vld [vmem:[%s2745_s3 + $0x74] ss:$8 sps:$4 sm:$0xff]  }
 0x1c5   :  { %v606_v51 = vmul.f32 0.1, %v514_v48  ;;  %v517_v23 = vadd.f32 %v1856_v50, %v2386_v25  ;;  %v508_v53 = vpop.f32.mrb[23].mxu0  ;;  %1705 = vmatprep.subr.bf16.mxu0 %v688_v47  ;;  %1865 = vmatprep.subr.bf16.mxu1 %v688_v47  ;;  %vm574_vm4 = vcmp.gt.f32.partialorder %v514_v48, 0.0  ;;  %v1924_v47 = vld [vmem:[%s2745_s3 + $0x30] ss:$8 sps:$4 sm:$0xff]  }
 0x1c6   :  { %v604_v54 = vmul.f32 0.1, %v506_v38  ;;  %v509_v39 = vadd.f32 %v508_v53, %v2336_v5  ;;  %1706 = vmatpush3.bf16.msra.mxu0 %v2414_v63  ;;  %1873 = vmatpush3.bf16.msra.mxu1 %v2414_v63  ;;  %vm572_vm5 = vcmp.gt.f32.partialorder %v506_v38, 0.0  ;;  %v1926_v50 = vld [vmem:[%s2745_s3 + $0x84] ss:$8 sps:$4 sm:$0xff]  }
 0x1c7   :  { %vm575_vm6 = vcmp.gt.f32.partialorder %v517_v23, 0.0  ;;  %v607_v22 = vmul.f32 0.1, %v517_v23  ;;  %1707 = vmatprep.subr.bf16.mxu0 %v689_v7  ;;  %1866 = vmatprep.subr.bf16.mxu1 %v689_v7  ;;  %v638_v56 = vsel %vm574_vm4, %v514_v48, %v606_v51  ;;  %v1919_v7 = vld [vmem:[%s2745_s3 + $0x60] ss:$8 sps:$4 sm:$0xff]  }
 0x1c8   :  { %vm573_vm7 = vcmp.gt.f32.partialorder %v509_v39, 0.0  ;;  %v605_v0 = vmul.f32 0.1, %v509_v39  ;;  %v636_v57 = vsel %vm572_vm5, %v506_v38, %v604_v54  ;;  %v1920_v48 = vld [vmem:[%s2745_s3 + $0x34] ss:$8 sps:$4 sm:$0xff]  }
 0x1c9   :  { %v639_v25 = vsel %vm575_vm6, %v517_v23, %v607_v22  ;;  %v1925_v38 = vld [vmem:[%s2745_s3 + $0x70] ss:$8 sps:$4 sm:$0xff]   ;;  %v1928_v51 = vld [vmem:[%s2745_s3 + $0x80] ss:$8 sps:$4 sm:$0xff]   ;;  %v1929_v23 = vld [vmem:[%s2745_s3 + $0x94] ss:$8 sps:$4 sm:$0xff]  }
 0x1ca   :  { %v1859_v52 = vpop.f32.mrb[24].mxu0  ;;  %1708 = vmatpush3.bf16.msra.mxu0 %v2412_v61  ;;  %1874 = vmatpush3.bf16.msra.mxu1 %v2412_v61  ;;  %v637_v5 = vsel %vm573_vm7, %v509_v39, %v605_v0  ;;  %v691_v60 = vpack.c.bf16 %v639_v25, %v638_v56  ;;  %v1931_v53 = vld [vmem:[%s2745_s3 + $0x90] ss:$8 sps:$4 sm:$0xff]   ;;  %v1932_v54 = vld [vmem:[%s2745_s3 + $0xa4] ss:$8 sps:$4 sm:$0xff]  }
 0x1cb   :  { %v530_v34 = vadd.f32 %v1859_v52, %v2400_v36  ;;  %v521_v63 = vpop.f32.mrb[25].mxu0  ;;  %v690_v28 = vpack.c.bf16 %v637_v5, %v636_v57  ;;  %v1934_v39 = vld [vmem:[%s2745_s3 + $0xa0] ss:$8 sps:$4 sm:$0xff]   ;;  %v1935_v22 = vld [vmem:[%s2745_s3 + $0xb4] ss:$8 sps:$4 sm:$0xff]  }
 0x1cc   :  { %v522_v62 = vadd.f32 %v521_v63, %v2394_v31  ;;  %v1860_v59 = vpop.f32.mrb[26].mxu0  ;;  %v1937_v0 = vld [vmem:[%s2745_s3 + $0xb0] ss:$8 sps:$4 sm:$0xff]   ;;  %v1938_v56 = vld [vmem:[%s2745_s3 + $0xc4] ss:$8 sps:$4 sm:$0xff]  }
 0x1cd   :  { %v610_v1 = vmul.f32 0.1, %v530_v34  ;;  %v533_v2 = vadd.f32 %v1860_v59, %v2402_v37  ;;  %v524_v35 = vpop.f32.mrb[27].mxu0  ;;  %1709 = vmatprep.subr.bf16.mxu0 %v690_v28  ;;  %1867 = vmatprep.subr.bf16.mxu1 %v690_v28  ;;  %vm578_vm8 = vcmp.gt.f32.partialorder %v530_v34, 0.0  ;;  %v1940_v25 = vld [vmem:[%s2745_s3 + $0xc0] ss:$8 sps:$4 sm:$0xff]   ;;  %v736_v28 = vpop.permute.xlu1 %735 }
 0x1ce   :  { %v608_v3 = vmul.f32 0.1, %v522_v62  ;;  %v525_v61 = vadd.f32 %v524_v35, %v2396_v32  ;;  %1710 = vmatpush3.bf16.msra.mxu0 %v2422_v20  ;;  %1875 = vmatpush3.bf16.msra.mxu1 %v2422_v20  ;;  %vm576_vm9 = vcmp.gt.f32.partialorder %v522_v62, 0.0  ;;  %v1941_v52 = vld [vmem:[%s2745_s3 + $0xd4] ss:$8 sps:$4 sm:$0xff]  }
 0x1cf   :  { %vm579_vm10 = vcmp.gt.f32.partialorder %v533_v2, 0.0  ;;  %v611_v36 = vmul.f32 0.1, %v533_v2  ;;  %1711 = vmatprep.subr.bf16.mxu0 %v691_v60  ;;  %1868 = vmatprep.subr.bf16.mxu1 %v691_v60  ;;  %v642_v4 = vsel %vm578_vm8, %v530_v34, %v610_v1  ;;  %v1943_v57 = vld [vmem:[%s2745_s3 + $0xd0] ss:$8 sps:$4 sm:$0xff]  }
 0x1d0   :  { %vm577_vm11 = vcmp.gt.f32.partialorder %v525_v61, 0.0  ;;  %v609_v31 = vmul.f32 0.1, %v525_v61  ;;  %v640_v8 = vsel %vm576_vm9, %v522_v62, %v608_v3  ;;  %v1944_v5 = vld [vmem:[%s2745_s3 + $0xe4] ss:$8 sps:$4 sm:$0xff]   ;;  %v731_v62 = vpop.permute.xlu0 %730 }
 0x1d1   :  { %v643_v37 = vsel %vm579_vm10, %v533_v2, %v611_v36  ;;  %v1946_v60 = vld [vmem:[%s2745_s3 + $0xe0] ss:$8 sps:$4 sm:$0xff]   ;;  %v1947_v34 = vld [vmem:[%s2745_s3 + $0xf4] ss:$8 sps:$4 sm:$0xff]   ;;  %v1949_v63 = vld [vmem:[%s2745_s3 + $0xf0] ss:$8 sps:$4 sm:$0xff]   ;;  %v2559_v59 = vpop.permute.xlu1 %745 }
 0x1d2   :  { %v1863_v6 = vpop.f32.mrb[28].mxu0  ;;  %1712 = vmatpush3.bf16.msra.mxu0 %v2420_v10  ;;  %1876 = vmatpush3.bf16.msra.mxu1 %v2420_v10  ;;  %v641_v32 = vsel %vm577_vm11, %v525_v61, %v609_v31  ;;  %v693_v11 = vpack.c.bf16 %v643_v37, %v642_v4 }
 0x1d3   :  { %v546_v13 = vadd.f32 %v1863_v6, %v2424_v26  ;;  %v537_v20 = vpop.f32.mrb[29].mxu0  ;;  %v692_v14 = vpack.c.bf16 %v641_v32, %v640_v8 }
 0x1d4   :  { %v538_v15 = vadd.f32 %v537_v20, %v2404_v40  ;;  %v1864_v16 = vpop.f32.mrb[30].mxu0  ;;  %v2561_v1 = vpop.permute.xlu0 %740 }
 0x1d5   :  { %v614_v12 = vmul.f32 0.1, %v546_v13  ;;  %v549_v18 = vadd.f32 %v1864_v16, %v2426_v43  ;;  %v540_v19 = vpop.f32.mrb[31].mxu0  ;;  %1713 = vmatprep.subr.bf16.mxu0 %v692_v14  ;;  %1869 = vmatprep.subr.bf16.mxu1 %v692_v14  ;;  %vm582_vm12 = vcmp.gt.f32.partialorder %v546_v13, 0.0  ;;  %v2563_v2 = vpop.permute.xlu1 %755 }
 0x1d6   :  { %v612_v21 = vmul.f32 0.1, %v538_v15  ;;  %v541_v10 = vadd.f32 %v540_v19, %v2407_v45  ;;  %1714 = vmatpush3.bf16.msra.mxu0 %v2431_v55  ;;  %1877 = vmatpush3.bf16.msra.mxu1 %v2431_v55  ;;  %vm580_vm13 = vcmp.gt.f32.partialorder %v538_v15, 0.0  ;;  %v1902_v55 = vld [vmem:[%s2745_s3] ss:$8 sps:$4 sm:$0xff]  }
 0x1d7   :  { %vm583_vm14 = vcmp.gt.f32.partialorder %v549_v18, 0.0  ;;  %v615_v26 = vmul.f32 0.1, %v549_v18  ;;  %1715 = vmatprep.subr.bf16.mxu0 %v693_v11  ;;  %1870 = vmatprep.subr.bf16.mxu1 %v693_v11  ;;  %v646_v24 = vsel %vm582_vm12, %v546_v13, %v614_v12 }
 0x1d8   :  { %vm581_vm15 = vcmp.gt.f32.partialorder %v541_v10, 0.0  ;;  %v613_v40 = vmul.f32 0.1, %v541_v10  ;;  %v644_v17 = vsel %vm580_vm13, %v538_v15, %v612_v21  ;;  %v2565_v35 = vpop.permute.xlu0 %750 }
 0x1d9   :  { %v647_v43 = vsel %vm583_vm14, %v549_v18, %v615_v26  ;;  %v2567_v3 = vpop.permute.xlu1 %765 }
 0x1da   :  { %1716 = vmatpush3.bf16.msra.mxu0 %v2429_v33  ;;  %1878 = vmatpush3.bf16.msra.mxu1 %v2429_v33  ;;  %v645_v27 = vsel %vm581_vm15, %v541_v10, %v613_v40  ;;  %v695_v45 = vpack.c.bf16 %v647_v43, %v646_v24  ;;  %v1905_v33 = vld [vmem:[%s2745_s3 + $0x40] ss:$8 sps:$4 sm:$0xff]  }
 0x1db   :  { %v694_v29 = vpack.c.bf16 %v645_v27, %v644_v17 }
 0x1dc   :  { %v2569_v61 = vpop.permute.xlu0 %760 }
 0x1dd   :  { %1717 = vmatprep.subr.bf16.mxu0 %v694_v29  ;;  %1871 = vmatprep.subr.bf16.mxu1 %v694_v29  ;;  %v2571_v36 = vpop.permute.xlu1 %775 }
 0x1de   :  { %1718 = vmatpush3.bf16.msra.mxu0 %v2435_v58  ;;  %1879 = vmatpush3.bf16.msra.mxu1 %v2435_v58  ;;  %v1910_v58 = vld [vmem:[%s2745_s3 + $0x54] ss:$8 sps:$4 sm:$0xff]  }
 0x1df   :  { %1719 = vmatprep.subr.bf16.mxu0 %v695_v45  ;;  %1872 = vmatprep.subr.bf16.mxu1 %v695_v45 }
 0x1e0   :  { %v2573_v31 = vpop.permute.xlu0 %770 }
 0x1e1   :  { %v2575_v4 = vpop.permute.xlu1 %785 }
 0x1e2   :  { %1720 = vmatpush3.bf16.msra.mxu0 %v2433_v9  ;;  %1880 = vmatpush3.bf16.msra.mxu1 %v2433_v9  ;;  %v1913_v9 = vld [vmem:[%s2745_s3 + $0x50] ss:$8 sps:$4 sm:$0xff]   ;;  %s1979_s3 = smov [#allocation3]  }
 0x1e3   :  { %s1624_s24 = sshll.u32 %s1979_s3, 4  ;;  %s1625_s24 = int_to_ptr.vmem [resolvable:$true] %s1624_s24 }
 0x1e4   :  { %v2577_v37 = vpop.permute.xlu0 %780  ;;  %s1954_s25 = scalar_lea.vmem %s1625_s24, 16  ;;  %s1958_s26 = scalar_lea.vmem %s1625_s24, 32 }
 0x1e5   :  { %1081 = vmatmul.mubr.bf16.vlgmr.msra.gmra.mrb[32].mxu0 %v1902_v55  ;;  %1113 = vmatmul.mubr.bf16.vlgmr.msra.gmra.mrb[0].mxu1 %v1905_v33  ;;  %v2579_v6 = vpop.permute.xlu1 %795  ;;  %p1955_p0 = scmp.ne.s32.totalorder %s1625_s24, %s1954_s25  ;;  %p1959_p1 = scmp.lt.s32.totalorder %s1625_s24, %s1625_s24 }
 0x1e6   :  { %1088 = vmatprep.mubr.bf16.mxu0 %v1908_v30  ;;  %1120 = vmatprep.mubr.bf16.mxu1 %v1910_v58  ;;  %p1960_p2 = scmp.lt.s32.totalorder %s1958_s26, %s1954_s25 }
 0x1e8   :  { %v2581_v8 = vpop.permute.xlu0 %790  ;;  %p1961_p3 = por %p1960_p2, %p1959_p1 }
 0x1e9   :  { %v2583_v32 = vpop.permute.xlu1 %805 }
 0x1ea   :  { %p1962_p4 = pnand %p1961_p3, %p1955_p0 }
 0x1ec   :  { %v2585_v11 = vpop.permute.xlu0 %800 }
 0x1ed   :  { %1089 = vmatmul.mubr.bf16.gmra.mrb[36].mxu0 %v1912_v41  ;;  %1121 = vmatmul.mubr.bf16.gmra.mrb[4].mxu1 %v1913_v9  ;;  %v2587_v13 = vpop.permute.xlu1 %815 }
 0x1ee   :  { %1096 = vmatprep.mubr.bf16.mxu0 %v1914_v42  ;;  %1128 = vmatprep.mubr.bf16.mxu1 %v1916_v44 }
 0x1f0   :  { %v2589_v20 = vpop.permute.xlu0 %810 }
 0x1f1   :  { %v2591_v14 = vpop.permute.xlu1 %825 }
 0x1f4   :  { %v2593_v15 = vpop.permute.xlu0 %820 }
 0x1f5   :  { %1097 = vmatmul.mubr.bf16.gmra.mrb[40].mxu0 %v1918_v46  ;;  %1129 = vmatmul.mubr.bf16.gmra.mrb[8].mxu1 %v1919_v7  ;;  %v2595_v16 = vpop.permute.xlu1 %835 }
 0x1f6   :  { %1104 = vmatprep.mubr.bf16.mxu0 %v1920_v48  ;;  %1136 = vmatprep.mubr.bf16.mxu1 %v1922_v49 }
 0x1f8   :  { %v2597_v12 = vpop.permute.xlu0 %830 }
 0x1f9   :  { %v1340_v18 = vpop.permute.xlu1 %1339 }
 0x1fc   :  { %v2599_v19 = vpop.permute.xlu0 %840 }
 0x1fd   :  { %1105 = vmatmul.mubr.bf16.gmra.mrb[44].mxu0 %v1924_v47  ;;  %1137 = vmatmul.mubr.bf16.gmra.mrb[12].mxu1 %v1925_v38  ;;  %v1350_v21 = vpop.permute.xlu1 %1349 }
 0x1fe   :  { %1144 = vmatprep.mubr.bf16.mxu1 %v1926_v50 }
 0x200   :  { %v1345_v10 = vpop.permute.xlu0 %1344 }
 0x201   :  { %v2601_v26 = vpop.permute.xlu1 %1359 }
 0x204   :  { %v2603_v40 = vpop.permute.xlu0 %1354 }
 0x205   :  { %1145 = vmatmul.mubr.bf16.gmra.mrb[16].mxu1 %v1928_v51  ;;  %v2605_v24 = vpop.permute.xlu1 %1369 }
 0x206   :  { %1152 = vmatprep.mubr.bf16.mxu1 %v1929_v23 }
 0x208   :  { %v2607_v43 = vpop.permute.xlu0 %1364 }
 0x209   :  { %v2609_v17 = vpop.permute.xlu1 %1379 }
 0x20c   :  { %v2611_v27 = vpop.permute.xlu0 %1374 }
 0x20d   :  { %1153 = vmatmul.mubr.bf16.gmra.mrb[20].mxu1 %v1931_v53  ;;  %v2613_v45 = vpop.permute.xlu1 %1389 }
 0x20e   :  { %1160 = vmatprep.mubr.bf16.mxu1 %v1932_v54 }
 0x210   :  { %v2615_v29 = vpop.permute.xlu0 %1384 }
 0x211   :  { %v2619_v50 = vpop.permute.xlu1 %1399 }
 0x214   :  { %v2621_v51 = vpop.permute.xlu0 %1394 }
 0x215   :  { %1161 = vmatmul.mubr.bf16.gmra.mrb[24].mxu1 %v1934_v39 }
 0x216   :  { %1168 = vmatprep.mubr.bf16.mxu1 %v1935_v22 }
 0x21d   :  { %1169 = vmatmul.mubr.bf16.gmra.mrb[28].mxu1 %v1937_v0 }
 0x21e   :  { %1176 = vmatprep.mubr.bf16.mxu1 %v1938_v56 }
 0x225   :  { %1177 = vmatmul.mubr.bf16.gmra.mrb[32].mxu1 %v1940_v25 }
 0x226   :  { %1184 = vmatprep.mubr.bf16.mxu1 %v1941_v52 }
 0x22d   :  { %1185 = vmatmul.mubr.bf16.gmra.mrb[36].mxu1 %v1943_v57 }
 0x22e   :  { %1192 = vmatprep.mubr.bf16.mxu1 %v1944_v5 }
 0x235   :  { %1193 = vmatmul.mubr.bf16.gmra.mrb[40].mxu1 %v1946_v60 }
 0x236   :  { %1200 = vmatprep.mubr.bf16.mxu1 %v1947_v34 }
 0x23d   :  { %1201 = vmatmul.mubr.bf16.gmra.mrb[44].mxu1 %v1949_v63 }
 0x2b8   :  { %v1721_v55 = vpop.f32.mrb[32].mxu0  ;;  %v1745_v33 = vpop.f32.mrb[0].mxu1 }
 0x2b9   :  { %v1722_v30 = vpop.f32.mrb[33].mxu0  ;;  %v1746_v58 = vpop.f32.mrb[1].mxu1 }
 0x2ba   :  { %v1723_v41 = vadd.f32 %v1722_v30, %v1721_v55  ;;  %v1747_v9 = vadd.f32 %v1746_v58, %v1745_v33  ;;  %v1724_v42 = vpop.f32.mrb[34].mxu0  ;;  %v1748_v44 = vpop.f32.mrb[2].mxu1 }
 0x2bb   :  { %v1725_v46 = vpop.f32.mrb[35].mxu0  ;;  %v1749_v7 = vpop.f32.mrb[3].mxu1 }
 0x2bc   :  { %v1083_v48 = vadd.f32 %v1723_v41, %v731_v62  ;;  %v1726_v49 = vadd.f32 %v1725_v46, %v1724_v42  ;;  %v2617_v47 = vadd.f32 %v1749_v7, %v1748_v44  ;;  %v2628_v42 = vpop.permute.xlu1 %1409  ;;  %v2630_v44 = vpop.permute.xlu0 %1404 }
 0x2be   :  { %vm1209_vm0 = vcmp.gt.f32.partialorder %v1083_v48, 0.0  ;;  %v1241_v38 = vmul.f32 0.1, %v1083_v48  ;;  %v1086_v23 = vadd.f32 %v1726_v49, %v736_v28 }
 0x2c0   :  { %v1273_v53 = vsel %vm1209_vm0, %v1083_v48, %v1241_v38  ;;  %v1727_v54 = vpop.f32.mrb[36].mxu0  ;;  %v1751_v39 = vpop.f32.mrb[4].mxu1  ;;  %vm1210_vm1 = vcmp.gt.f32.partialorder %v1086_v23, 0.0  ;;  %v1242_v22 = vmul.f32 0.1, %v1086_v23 }
 0x2c1   :  { %v1728_v0 = vpop.f32.mrb[37].mxu0  ;;  %v1752_v56 = vpop.f32.mrb[5].mxu1  ;;  %v1497_v25 = vmul.f32 %v1340_v18, %v1273_v53 }
 0x2c2   :  { %v1729_v52 = vadd.f32 %v1728_v0, %v1727_v54  ;;  %v1753_v57 = vadd.f32 %v1752_v56, %v1751_v39  ;;  %v1730_v5 = vpop.f32.mrb[38].mxu0  ;;  %v1754_v60 = vpop.f32.mrb[6].mxu1  ;;  %v1274_v34 = vsel %vm1210_vm1, %v1086_v23, %v1242_v22 }
 0x2c3   :  { %v1731_v63 = vpop.f32.mrb[39].mxu0  ;;  %v1755_v62 = vpop.f32.mrb[7].mxu1  ;;  %v1498_v55 = vmul.f32 %v1345_v10, %v1274_v34  ;;  %v1530_v58 = vsel %vm1529_vm2, %v1497_v25, 0.0  ;;  %v1115_v34 = vadd.f32 %v1747_v9, %v2573_v31 }
 0x2c4   :  { %v1091_v33 = vadd.f32 %v1729_v52, %v2561_v1  ;;  %v1732_v28 = vadd.f32 %v1731_v63, %v1730_v5  ;;  %v2624_v30 = vadd.f32 %v1755_v62, %v1754_v60 }
 0x2c5   :  { %v1531_v41 = vsel %vm1529_vm2, %v1498_v55, 0.0  ;;  %vm1217_vm7 = vcmp.gt.f32.partialorder %v1115_v34, 0.0 }
 0x2c6   :  { %vm1211_vm3 = vcmp.gt.f32.partialorder %v1091_v33, 0.0  ;;  %v1243_v18 = vmul.f32 0.1, %v1091_v33  ;;  %v1532_v46 = vadd.f32 %v1531_v41, %v1530_v58  ;;  %v1094_v7 = vadd.f32 %v1732_v28, %v2559_v59  ;;  %v2640_v28 = vpop.permute.xlu0 %1414 }
 0x2c8   :  { %v1275_v48 = vsel %vm1211_vm3, %v1091_v33, %v1243_v18  ;;  %v1733_v10 = vpop.f32.mrb[40].mxu0  ;;  %v1757_v49 = vpop.f32.mrb[8].mxu1  ;;  %vm1212_vm4 = vcmp.gt.f32.partialorder %v1094_v7, 0.0  ;;  %v1244_v38 = vmul.f32 0.1, %v1094_v7 }
 0x2c9   :  { %v1499_v1 = vmul.f32 %v1350_v21, %v1275_v48  ;;  %v1734_v23 = vpop.f32.mrb[41].mxu0  ;;  %v1758_v53 = vpop.f32.mrb[9].mxu1 }
 0x2ca   :  { %v1735_v54 = vadd.f32 %v1734_v23, %v1733_v10  ;;  %v1736_v39 = vpop.f32.mrb[42].mxu0  ;;  %v1760_v22 = vpop.f32.mrb[10].mxu1  ;;  %v1276_v56 = vsel %vm1212_vm4, %v1094_v7, %v1244_v38  ;;  %v1759_v25 = vadd.f32 %v1758_v53, %v1757_v49  ;;  %v1123_v23 = vadd.f32 %v1753_v57, %v2577_v37 }
 0x2cb   :  { %v1533_v0 = vsel %vm1529_vm2, %v1499_v1, 0.0  ;;  %v1737_v52 = vpop.f32.mrb[43].mxu0  ;;  %v1761_v5 = vpop.f32.mrb[11].mxu1  ;;  %v1500_v59 = vmul.f32 %v2603_v40, %v1276_v56  ;;  %v1249_v40 = vmul.f32 0.1, %v1115_v34 }
 0x2cc   :  { %v1534_v60 = vadd.f32 %v1533_v0, %v1532_v46  ;;  %v1099_v21 = vadd.f32 %v1735_v54, %v2565_v35  ;;  %v1738_v63 = vadd.f32 %v1737_v52, %v1736_v39  ;;  %v1762_v55 = vadd.f32 %v1761_v5, %v1760_v22  ;;  %v2638_v33 = vpop.permute.xlu1 %1419  ;;  %v2648_v52 = vpop.permute.xlu0 %1424 }
 0x2cd   :  { %v1535_v62 = vsel %vm1529_vm2, %v1500_v59, 0.0  ;;  %v1118_v35 = vadd.f32 %v2617_v47, %v2571_v36  ;;  %v1281_v5 = vsel %vm1217_vm7, %v1115_v34, %v1249_v40  ;;  %v1251_v59 = vmul.f32 0.1, %v1123_v23 }
 0x2ce   :  { %v1536_v58 = vadd.f32 %v1535_v62, %v1534_v60  ;;  %vm1213_vm5 = vcmp.gt.f32.partialorder %v1099_v21, 0.0  ;;  %v1245_v41 = vmul.f32 0.1, %v1099_v21  ;;  %v1102_v18 = vadd.f32 %v1738_v63, %v2563_v2 }
 0x2cf   :  { %vm1218_vm8 = vcmp.gt.f32.partialorder %v1118_v35, 0.0  ;;  %v1250_v57 = vmul.f32 0.1, %v1118_v35  ;;  %v1126_v62 = vadd.f32 %v2624_v30, %v2575_v4  ;;  %vm1219_vm10 = vcmp.gt.f32.partialorder %v1123_v23, 0.0 }
 0x2d0   :  { %v1739_v46 = vpop.f32.mrb[44].mxu0  ;;  %v1763_v7 = vpop.f32.mrb[12].mxu1  ;;  %v1277_v48 = vsel %vm1213_vm5, %v1099_v21, %v1245_v41  ;;  %vm1214_vm6 = vcmp.gt.f32.partialorder %v1102_v18, 0.0  ;;  %v1246_v49 = vmul.f32 0.1, %v1102_v18  ;;  %v1131_v34 = vadd.f32 %v1759_v25, %v2581_v8 }
 0x2d1   :  { %v1740_v31 = vpop.f32.mrb[45].mxu0  ;;  %v1764_v9 = vpop.f32.mrb[13].mxu1  ;;  %v1501_v10 = vmul.f32 %v2601_v26, %v1277_v48  ;;  %v1282_v40 = vsel %vm1218_vm8, %v1118_v35, %v1250_v57  ;;  %v1134_v8 = vadd.f32 %v1762_v55, %v2579_v6  ;;  %vm1220_vm12 = vcmp.gt.f32.partialorder %v1126_v62, 0.0 }
 0x2d2   :  { %v1742_v1 = vpop.f32.mrb[46].mxu0  ;;  %v1766_v38 = vpop.f32.mrb[14].mxu1  ;;  %v1741_v53 = vadd.f32 %v1740_v31, %v1739_v46  ;;  %v1278_v22 = vsel %vm1214_vm6, %v1102_v18, %v1246_v49  ;;  %v1765_v0 = vadd.f32 %v1764_v9, %v1763_v7  ;;  %v1252_v49 = vmul.f32 0.1, %v1126_v62 }
 0x2d3   :  { %v1743_v2 = vpop.f32.mrb[47].mxu0  ;;  %v1767_v54 = vpop.f32.mrb[15].mxu1  ;;  %v1537_v39 = vsel %vm1529_vm2, %v1501_v10, 0.0  ;;  %v1502_v26 = vmul.f32 %v2607_v43, %v1278_v22  ;;  %v1283_v10 = vsel %vm1219_vm10, %v1123_v23, %v1251_v59  ;;  %vm1221_vm13 = vcmp.gt.f32.partialorder %v1131_v34, 0.0 }
 0x2d4   :  { %v1744_v56 = vadd.f32 %v1743_v2, %v1742_v1  ;;  %v1538_v36 = vadd.f32 %v1537_v39, %v1536_v58  ;;  %v2651_v47 = vpop.permute.xlu1 %1429  ;;  %v1107_v60 = vadd.f32 %v1741_v53, %v2569_v61  ;;  %v1768_v63 = vadd.f32 %v1767_v54, %v1766_v38  ;;  %v2660_v7 = vpop.permute.xlu0 %1434 }
 0x2d5   :  { %v1539_v21 = vsel %vm1529_vm2, %v1502_v26, 0.0  ;;  %v1505_v61 = vmul.f32 %v2609_v17, %v1281_v5  ;;  %v1253_v1 = vmul.f32 0.1, %v1131_v34  ;;  %v1506_v54 = vmul.f32 %v2615_v29, %v1282_v40 }
 0x2d6   :  { %v1110_v37 = vadd.f32 %v1744_v56, %v2567_v3  ;;  %v1540_v41 = vadd.f32 %v1539_v21, %v1538_v36  ;;  %vm1215_vm9 = vcmp.gt.f32.partialorder %v1107_v60, 0.0  ;;  %v1247_v58 = vmul.f32 0.1, %v1107_v60 }
 0x2d7   :  { %v1284_v23 = vsel %vm1220_vm12, %v1126_v62, %v1252_v49  ;;  %v1254_v39 = vmul.f32 0.1, %v1134_v8  ;;  %v1142_v6 = vadd.f32 %v1768_v63, %v2583_v32  ;;  %v1545_v56 = vsel %vm1529_vm2, %v1505_v61, 0.0 }
 0x2d8   :  { %v1769_v43 = vpop.f32.mrb[16].mxu1  ;;  %vm1216_vm11 = vcmp.gt.f32.partialorder %v1110_v37, 0.0  ;;  %v1248_v18 = vmul.f32 0.1, %v1110_v37  ;;  %v1279_v3 = vsel %vm1215_vm9, %v1107_v60, %v1247_v58  ;;  %v2664_v9 = vpop.permute.xlu1 %1439  ;;  %v1507_v36 = vmul.f32 %v2613_v45, %v1283_v10 }
 0x2d9   :  { %v1770_v46 = vpop.f32.mrb[17].mxu1  ;;  %v1503_v48 = vmul.f32 %v2605_v24, %v1279_v3  ;;  %v1139_v24 = vadd.f32 %v1765_v0, %v2585_v11  ;;  %v2673_v55 = vpop.permute.xlu0 %845  ;;  %v1285_v26 = vsel %vm1221_vm13, %v1131_v34, %v1253_v1  ;;  %vm1222_vm14 = vcmp.gt.f32.partialorder %v1134_v8, 0.0 }
 0x2da   :  { %v1280_v4 = vsel %vm1216_vm11, %v1110_v37, %v1248_v18  ;;  %v1771_v30 = vadd.f32 %v1770_v46, %v1769_v43  ;;  %v1772_v31 = vpop.f32.mrb[18].mxu1  ;;  %v1547_v32 = vsel %vm1529_vm2, %v1506_v54, 0.0  ;;  %v1508_v59 = vmul.f32 %v2621_v51, %v1284_v23 }
 0x2db   :  { %v1504_v25 = vmul.f32 %v2611_v27, %v1280_v4  ;;  %v1773_v17 = vpop.f32.mrb[19].mxu1  ;;  %v1541_v38 = vsel %vm1529_vm2, %v1503_v48, 0.0  ;;  %v1255_v0 = vmul.f32 0.1, %v1139_v24  ;;  %vm1223_vm15 = vcmp.gt.f32.partialorder %v1139_v24, 0.0 }
 0x2dc   :  { %v1774_v53 = vadd.f32 %v1773_v17, %v1772_v31  ;;  %v1542_v35 = vadd.f32 %v1541_v38, %v1540_v41  ;;  %v2677_v11 = vpop.permute.xlu1 %1444  ;;  %v1147_v29 = vadd.f32 %v1771_v30, %v2589_v20  ;;  %v1286_v45 = vsel %vm1222_vm14, %v1134_v8, %v1254_v39 }
 0x2dd   :  { %v1543_v2 = vsel %vm1529_vm2, %v1504_v25, 0.0  ;;  %v1256_v41 = vmul.f32 0.1, %v1142_v6  ;;  %v1549_v58 = vsel %vm1529_vm2, %v1507_v36, 0.0  ;;  %v1509_v43 = vmul.f32 %v2619_v50, %v1285_v26  ;;  %v2686_v46 = vpop.permute.xlu0 %850 }
 0x2de   :  { %v1544_v22 = vadd.f32 %v1543_v2, %v1542_v35  ;;  %v1150_v21 = vadd.f32 %v1774_v53, %v2587_v13  ;;  %vm1224_vm0 = vcmp.gt.f32.partialorder %v1142_v6, 0.0  ;;  %v1287_v20 = vsel %vm1223_vm15, %v1139_v24, %v1255_v0 }
 0x2df   :  { %v1257_v61 = vmul.f32 0.1, %v1147_v29  ;;  %v1551_v51 = vsel %vm1529_vm2, %v1508_v59, 0.0  ;;  %v1510_v13 = vmul.f32 %v2630_v44, %v1286_v45  ;;  %vm1225_vm1 = vcmp.gt.f32.partialorder %v1147_v29, 0.0 }
 0x2e0   :  { %v1775_v27 = vpop.f32.mrb[20].mxu1  ;;  %v1546_v60 = vadd.f32 %v1545_v56, %v1544_v22  ;;  %v1258_v40 = vmul.f32 0.1, %v1150_v21  ;;  %v2690_v48 = vpop.permute.xlu1 %1449  ;;  %v1288_v4 = vsel %vm1224_vm0, %v1142_v6, %v1256_v41  ;;  %vm1226_vm3 = vcmp.gt.f32.partialorder %v1150_v21, 0.0 }
 0x2e1   :  { %v1776_v5 = vpop.f32.mrb[21].mxu1  ;;  %v1553_v10 = vsel %vm1529_vm2, %v1509_v43, 0.0  ;;  %v1289_v25 = vsel %vm1225_vm1, %v1147_v29, %v1257_v61  ;;  %v1555_v38 = vsel %vm1529_vm2, %v1510_v13, 0.0  ;;  %v1512_v53 = vmul.f32 %v2640_v28, %v1288_v4  ;;  %v2698_v39 = vpop.permute.xlu0 %855 }
 0x2e2   :  { %v1777_v37 = vadd.f32 %v1776_v5, %v1775_v27  ;;  %v1778_v57 = vpop.f32.mrb[22].mxu1  ;;  %v1548_v62 = vadd.f32 %v1547_v32, %v1546_v60  ;;  %v1290_v35 = vsel %vm1226_vm3, %v1150_v21, %v1258_v40  ;;  %v1513_v22 = vmul.f32 %v2638_v33, %v1289_v25 }
 0x2e3   :  { %v1779_v63 = vpop.f32.mrb[23].mxu1  ;;  %v1559_v28 = vsel %vm1529_vm2, %v1512_v53, 0.0  ;;  %v1514_v26 = vmul.f32 %v2648_v52, %v1290_v35 }
 0x2e4   :  { %v1780_v34 = vadd.f32 %v1779_v63, %v1778_v57  ;;  %v1550_v18 = vadd.f32 %v1549_v58, %v1548_v62  ;;  %v1155_v3 = vadd.f32 %v1777_v37, %v2593_v15  ;;  %v1511_v15 = vmul.f32 %v2628_v42, %v1287_v20  ;;  %v1455_v6 = vpop.permute.xlu1 %1454 }
 0x2e5   :  { %v1561_v29 = vsel %vm1529_vm2, %v1513_v22, 0.0  ;;  %v861_v45 = vpop.permute.xlu0 %860  ;;  %v1563_v52 = vsel %vm1529_vm2, %v1514_v26, 0.0 }
 0x2e6   :  { %v1552_v30 = vadd.f32 %v1551_v51, %v1550_v18  ;;  %v1158_v50 = vadd.f32 %v1780_v34, %v2591_v14  ;;  %v1259_v17 = vmul.f32 0.1, %v1155_v3  ;;  %vm1227_vm4 = vcmp.gt.f32.partialorder %v1155_v3, 0.0 }
 0x2e7   :  { %v1557_v42 = vsel %vm1529_vm2, %v1511_v15, 0.0 }
 0x2e8   :  { %v1781_v31 = vpop.f32.mrb[24].mxu1  ;;  %v1554_v8 = vadd.f32 %v1553_v10, %v1552_v30  ;;  %v1260_v14 = vmul.f32 0.1, %v1158_v50  ;;  %vm1228_vm5 = vcmp.gt.f32.partialorder %v1158_v50, 0.0  ;;  %v1291_v56 = vsel %vm1227_vm4, %v1155_v3, %v1259_v17  ;;  %v1460_v41 = vpop.permute.xlu1 %1459 }
 0x2e9   :  { %v1782_v49 = vpop.f32.mrb[25].mxu1  ;;  %v1515_v37 = vmul.f32 %v2651_v47, %v1291_v56 }
 0x2ea   :  { %v1783_v1 = vadd.f32 %v1782_v49, %v1781_v31  ;;  %v1784_v44 = vpop.f32.mrb[26].mxu1  ;;  %v1556_v2 = vadd.f32 %v1555_v38, %v1554_v8  ;;  %v1292_v0 = vsel %vm1228_vm5, %v1158_v50, %v1260_v14  ;;  %v866_v50 = vpop.permute.xlu0 %865 }
 0x2eb   :  { %v1785_v24 = vpop.f32.mrb[27].mxu1  ;;  %v1516_v62 = vmul.f32 %v2660_v7, %v1292_v0  ;;  %v1565_v47 = vsel %vm1529_vm2, %v1515_v37, 0.0 }
 0x2ec   :  { %v1163_v54 = vadd.f32 %v1783_v1, %v2597_v12  ;;  %v1786_v23 = vadd.f32 %v1785_v24, %v1784_v44  ;;  %v1558_v27 = vadd.f32 %v1557_v42, %v1556_v2  ;;  %v1465_v15 = vpop.permute.xlu1 %1464 }
 0x2ed   :  { %v1567_v51 = vsel %vm1529_vm2, %v1516_v62, 0.0 }
 0x2ee   :  { %v1261_v36 = vmul.f32 0.1, %v1163_v54  ;;  %vm1229_vm6 = vcmp.gt.f32.partialorder %v1163_v54, 0.0  ;;  %v1166_v5 = vadd.f32 %v1786_v23, %v2595_v16  ;;  %v1560_v12 = vadd.f32 %v1559_v28, %v1558_v27  ;;  %v871_v14 = vpop.permute.xlu0 %870 }
 0x2f0   :  { %v1787_v60 = vpop.f32.mrb[28].mxu1  ;;  %vm1230_vm7 = vcmp.gt.f32.partialorder %v1166_v5, 0.0  ;;  %v1262_v33 = vmul.f32 0.1, %v1166_v5  ;;  %v1562_v32 = vadd.f32 %v1561_v29, %v1560_v12  ;;  %v1293_v59 = vsel %vm1229_vm6, %v1163_v54, %v1261_v36  ;;  %v1470_v23 = vpop.permute.xlu1 %1469 }
 0x2f1   :  { %v1788_v57 = vpop.f32.mrb[29].mxu1  ;;  %v1517_v18 = vmul.f32 %v2664_v9, %v1293_v59 }
 0x2f2   :  { %v1789_v21 = vadd.f32 %v1788_v57, %v1787_v60  ;;  %v1790_v63 = vpop.f32.mrb[30].mxu1  ;;  %v1564_v58 = vadd.f32 %v1563_v52, %v1562_v32  ;;  %v1294_v43 = vsel %vm1230_vm7, %v1166_v5, %v1262_v33  ;;  %v876_v33 = vpop.permute.xlu0 %875 }
 0x2f3   :  { %v1791_v16 = vpop.f32.mrb[31].mxu1  ;;  %v1518_v13 = vmul.f32 %v2677_v11, %v1294_v43 }
 0x2f4   :  { %v1171_v34 = vadd.f32 %v1789_v21, %v2599_v19  ;;  %v1792_v20 = vadd.f32 %v1791_v16, %v1790_v63  ;;  %v1566_v61 = vadd.f32 %v1565_v47, %v1564_v58  ;;  %v1569_v19 = vsel %vm1529_vm2, %v1517_v18, 0.0 }
 0x2f5   :  { %v1571_v17 = vsel %vm1529_vm2, %v1518_v13, 0.0 }
 0x2f6   :  { %vm1231_vm8 = vcmp.gt.f32.partialorder %v1171_v34, 0.0  ;;  %v1263_v3 = vmul.f32 0.1, %v1171_v34  ;;  %v1174_v7 = vadd.f32 %v1792_v20, %v2673_v55  ;;  %v1568_v40 = vadd.f32 %v1567_v51, %v1566_v61  ;;  %v881_v20 = vpop.permute.xlu0 %880 }
 0x2f8   :  { %v1295_v4 = vsel %vm1231_vm8, %v1171_v34, %v1263_v3  ;;  %v1793_v30 = vpop.f32.mrb[32].mxu1  ;;  %vm1232_vm9 = vcmp.gt.f32.partialorder %v1174_v7, 0.0  ;;  %v1264_v10 = vmul.f32 0.1, %v1174_v7  ;;  %v1570_v49 = vadd.f32 %v1569_v19, %v1568_v40 }
 0x2f9   :  { %v1519_v31 = vmul.f32 %v2690_v48, %v1295_v4  ;;  %v1794_v9 = vpop.f32.mrb[33].mxu1 }
 0x2fa   :  { %v1795_v8 = vadd.f32 %v1794_v9, %v1793_v30  ;;  %v1796_v25 = vpop.f32.mrb[34].mxu1  ;;  %v1296_v55 = vsel %vm1232_vm9, %v1174_v7, %v1264_v10  ;;  %v1572_v44 = vadd.f32 %v1571_v17, %v1570_v49  ;;  %v886_v10 = vpop.permute.xlu0 %885 }
 0x2fb   :  { %v1573_v11 = vsel %vm1529_vm2, %v1519_v31, 0.0  ;;  %v1797_v1 = vpop.f32.mrb[35].mxu1  ;;  %v1520_v38 = vmul.f32 %v1455_v6, %v1296_v55 }
 0x2fc   :  { %v1179_v53 = vadd.f32 %v1795_v8, %v2686_v46  ;;  %v1798_v35 = vadd.f32 %v1797_v1, %v1796_v25  ;;  %v1574_v24 = vadd.f32 %v1573_v11, %v1572_v44 }
 0x2fd   :  { %v1575_v48 = vsel %vm1529_vm2, %v1520_v38, 0.0 }
 0x2fe   :  { %vm1233_vm10 = vcmp.gt.f32.partialorder %v1179_v53, 0.0  ;;  %v1265_v2 = vmul.f32 0.1, %v1179_v53  ;;  %v1182_v54 = vadd.f32 %v1798_v35, %v2698_v39  ;;  %v1576_v42 = vadd.f32 %v1575_v48, %v1574_v24  ;;  %v1475_v39 = vpop.permute.xlu1 %1474 }
 0x300   :  { %v1297_v22 = vsel %vm1233_vm10, %v1179_v53, %v1265_v2  ;;  %v1799_v27 = vpop.f32.mrb[36].mxu1  ;;  %vm1234_vm11 = vcmp.gt.f32.partialorder %v1182_v54, 0.0  ;;  %v1266_v36 = vmul.f32 0.1, %v1182_v54 }
 0x301   :  { %v1521_v56 = vmul.f32 %v1460_v41, %v1297_v22  ;;  %v1800_v28 = vpop.f32.mrb[37].mxu1 }
 0x302   :  { %v1801_v6 = vadd.f32 %v1800_v28, %v1799_v27  ;;  %v1802_v26 = vpop.f32.mrb[38].mxu1  ;;  %v1298_v5 = vsel %vm1234_vm11, %v1182_v54, %v1266_v36  ;;  %v1480_v61 = vpop.permute.xlu1 %1479 }
 0x303   :  { %v1577_v46 = vsel %vm1529_vm2, %v1521_v56, 0.0  ;;  %v1803_v12 = vpop.f32.mrb[39].mxu1  ;;  %v1522_v60 = vmul.f32 %v1465_v15, %v1298_v5 }
 0x304   :  { %v1578_v0 = vadd.f32 %v1577_v46, %v1576_v42  ;;  %v1187_v29 = vadd.f32 %v1801_v6, %v861_v45  ;;  %v1804_v37 = vadd.f32 %v1803_v12, %v1802_v26  ;;  %v1605_v26 = vlaneseq }
 0x305   :  { %v1579_v57 = vsel %vm1529_vm2, %v1522_v60, 0.0 }
 0x306   :  { %vm1235_vm12 = vcmp.gt.f32.partialorder %v1187_v29, 0.0  ;;  %v1267_v32 = vmul.f32 0.1, %v1187_v29  ;;  %v1190_v59 = vadd.f32 %v1804_v37, %v866_v50  ;;  %v1580_v21 = vadd.f32 %v1579_v57, %v1578_v0  ;;  %v1485_v49 = vpop.permute.xlu1 %1484 }
 0x307   :  { %v1606_v12 = vshrl.u32 %v1605_v26, 7 }
 0x308   :  { %v1299_v63 = vsel %vm1235_vm12, %v1187_v29, %v1267_v32  ;;  %vm1236_vm13 = vcmp.gt.f32.partialorder %v1190_v59, 0.0  ;;  %v1268_v52 = vmul.f32 0.1, %v1190_v59  ;;  %v1805_v62 = vpop.f32.mrb[40].mxu1 }
 0x309   :  { %v1523_v16 = vmul.f32 %v1470_v23, %v1299_v63  ;;  %v1806_v41 = vpop.f32.mrb[41].mxu1  ;;  %v1607_v29 = vsub.s32 0, %v1606_v12 }
 0x30a   :  { %v1300_v58 = vsel %vm1236_vm13, %v1190_v59, %v1268_v52  ;;  %v1807_v43 = vadd.f32 %v1806_v41, %v1805_v62  ;;  %v1808_v34 = vpop.f32.mrb[42].mxu1  ;;  %v1495_v22 = vpop.permute.xlu1 %1494 }
 0x30b   :  { %v1581_v45 = vsel %vm1529_vm2, %v1523_v16, 0.0  ;;  %v1524_v47 = vmul.f32 %v1475_v39, %v1300_v58  ;;  %v1809_v18 = vpop.f32.mrb[43].mxu1 }
 0x30c   :  { %v1582_v3 = vadd.f32 %v1581_v45, %v1580_v21  ;;  %v1195_v51 = vadd.f32 %v1807_v43, %v871_v14  ;;  %v1810_v13 = vadd.f32 %v1809_v18, %v1808_v34  ;;  %v1490_v14 = vpop.permute.xlu0 %1489 }
 0x30d   :  { %v1583_v7 = vsel %vm1529_vm2, %v1524_v47, 0.0 }
 0x30e   :  { %v1584_v40 = vadd.f32 %v1583_v7, %v1582_v3  ;;  %vm1237_vm14 = vcmp.gt.f32.partialorder %v1195_v51, 0.0  ;;  %v1269_v4 = vmul.f32 0.1, %v1195_v51  ;;  %v1198_v30 = vadd.f32 %v1810_v13, %v876_v33 }
 0x310   :  { %v1301_v50 = vsel %vm1237_vm14, %v1195_v51, %v1269_v4  ;;  %vm1238_vm15 = vcmp.gt.f32.partialorder %v1198_v30, 0.0  ;;  %v1270_v19 = vmul.f32 0.1, %v1198_v30  ;;  %v1811_v31 = vpop.f32.mrb[44].mxu1  ;;  %v1603_v33 = vpop.permute.xlu0 %1602 }
 0x311   :  { %v1525_v9 = vmul.f32 %v1480_v61, %v1301_v50  ;;  %v1812_v15 = vpop.f32.mrb[45].mxu1  ;;  %v1608_v57 = vrot.slane %v1603_v33, %v1607_v29 }
 0x312   :  { %v1302_v8 = vsel %vm1238_vm15, %v1198_v30, %v1270_v19  ;;  %v1813_v25 = vadd.f32 %v1812_v15, %v1811_v31  ;;  %v1814_v17 = vpop.f32.mrb[46].mxu1 }
 0x313   :  { %v1585_v11 = vsel %vm1529_vm2, %v1525_v9, 0.0  ;;  %v1526_v55 = vmul.f32 %v1485_v49, %v1302_v8  ;;  %v1815_v1 = vpop.f32.mrb[47].mxu1 }
 0x314   :  { %v1586_v44 = vadd.f32 %v1585_v11, %v1584_v40  ;;  %v1203_v38 = vadd.f32 %v1813_v25, %v881_v20  ;;  %v1816_v53 = vadd.f32 %v1815_v1, %v1814_v17 }
 0x315   :  { %v1587_v35 = vsel %vm1529_vm2, %v1526_v55, 0.0 }
 0x316   :  { %v1588_v24 = vadd.f32 %v1587_v35, %v1586_v44  ;;  %vm1239_vm0 = vcmp.gt.f32.partialorder %v1203_v38, 0.0  ;;  %v1271_v48 = vmul.f32 0.1, %v1203_v38  ;;  %v1206_v2 = vadd.f32 %v1816_v53, %v886_v10 }
 0x318   :  { %v1303_v54 = vsel %vm1239_vm0, %v1203_v38, %v1271_v48  ;;  %vm1240_vm1 = vcmp.gt.f32.partialorder %v1206_v2, 0.0  ;;  %v1272_v23 = vmul.f32 0.1, %v1206_v2 }
 0x319   :  { %v1527_v42 = vmul.f32 %v1490_v14, %v1303_v54 }
 0x31a   :  { %v1304_v27 = vsel %vm1240_vm1, %v1206_v2, %v1272_v23 }
 0x31b   :  { %v1589_v56 = vsel %vm1529_vm2, %v1527_v42, 0.0  ;;  %v1528_v36 = vmul.f32 %v1495_v22, %v1304_v27 }
 0x31c   :  { %v1590_v28 = vadd.f32 %v1589_v56, %v1588_v24 }
 0x31d   :  { %v1591_v6 = vsel %vm1529_vm2, %v1528_v36, 0.0  ;;  %vm1616_vm2 = vcmask 57344  }
 0x31e   :  { %v1592_v46 = vadd.f32 %v1591_v6, %v1590_v28 }
 0x320   :  { %v1593_v5 = vrot.slane %v1592_v46, 4 }
 0x322   :  { %v1594_v0 = vadd.f32 %v1593_v5, %v1592_v46 }
 0x324   :  { %v1595_v60 = vrot.slane %v1594_v0, 2 }
 0x326   :  { %v1596_v37 = vadd.f32 %v1595_v60, %v1594_v0 }
 0x328   :  { %v1597_v39 = vrot.slane %v1596_v37, 1 }
 0x32a   :  { %v1598_v32 = vadd.f32 %v1597_v39, %v1596_v37 }
 0x32c   :  { %v1609_v59 = vadd.f32 %v1608_v57, %v1598_v32 }
 0x32e   :  { %v1680_v21 = vmul.f32 -1.442695, %v1609_v59 }
 0x330   :  { %1950 = vpow2.f32 %v1680_v21 }
 0x33a   :  { %v1951_v63 = vpop.eup %1950 }
 0x33b   :  { %v1613_v52 = vadd.f32 1.0, %v1951_v63 }
 0x33d   :  { %1952 = vrcp.f32 %v1613_v52 }
 0x347   :  { %v1953_v62 = vpop.eup %1952 }
 0x348   :  { %1617 = vst.msk [vmem:[#allocation3] sm:$0x1] %vm1616_vm2, %v1953_v62 }
 0x349   :  { %1965 = shalt.err (!%p1962_p4)
}
 0x34a   :  { %s1966_s28 = scalar_lea.hbm %s2749_s7, 16 }
 0x34b   :  { %p1967_p5 = scmp.ne.s32.totalorder %s2749_s7, %s1966_s28  ;;  %p1970_p6 = scmp.lt.u32.totalorder %s1966_s28, %s2749_s7 }
 0x34d   :  { %p1972_p7 = pnand %p1970_p6, %p1967_p5 }
 0x34f   :  { %1975 = shalt.err (!%p1972_p7)
}
 0x350   :  { %1627 = dma.vmem_to_hbm [thread:$0]  %s1625_s24, 16, %s2749_s7, [#allocation4]  }
 0x351   :  { %1976 = dma.done.wait [#allocation4], 16  }
 0x352   :  { %1977 = vsyncadd [#allocation4], 4294967280 }
 0x353   :  { %1631 = vsyncpa [#allocation4], 1 }

</bundles_post_ra>
